<compile_context>
chip_gen: v5e
topology: v5e:2x2
jax: 0.10.0
libtpu: 0.0.40
codegen_flags: <defaults>
</compile_context>

<pallas_src>
import math
import functools

import jax
import jax.numpy as jnp
from jax.experimental import pallas as pl
from jax.experimental.pallas import tpu as pltpu


def _vmem_capacity_bytes():
    try:
        return int(pltpu.get_tpu_info().vmem_capacity_bytes)
    except Exception:
        return 64 * 1024 * 1024


_VMEM_CAP = _vmem_capacity_bytes()
_VMEM_LIMIT = min(int(_VMEM_CAP * 0.75), 100 * 1024 * 1024)
_FFN_COL_CAP = 2048 if _VMEM_CAP >= 96 * 1024 * 1024 else 512


def _row_tile(M, cap=256):
    cands = [t for t in range(8, M + 1, 8) if M % t == 0 and t <= cap]
    if not cands:
        return M
    multi = [t for t in cands if M // t >= 2]      # prefer >=2 tiles for megacore
    return max(multi) if multi else max(cands)


def _col_tile(N, cap=512):
    cands = [t for t in range(128, N + 1, 128) if N % t == 0 and t <= cap]
    return max(cands) if cands else N


# ---------------------------------------------------------------------------
# Kernel 1: LayerNorm + fused [Wq|Wk|Wv] projection + RoPE epilogue
# ---------------------------------------------------------------------------

def _proj_kernel(x_ref, g_ref, bt_ref, w_ref, b_ref, cos_ref, se_ref, so_ref,
                 *out_refs, n_rope):
    # x_ref: (1, tl, D) f32   w_ref: (D, nC*D) bf16   b_ref: (1, nC*D) f32
    # cos/se/so: (tl, D) f32 (parity-masked interleaved-pair tables)
    # out_refs[c]: (1, tl, D) bf16 (lane-dense)
    D = x_ref.shape[2]

    x = x_ref[0].astype(jnp.float32)
    mu = jnp.mean(x, axis=-1, keepdims=True)
    xc = x - mu
    var = jnp.mean(xc * xc, axis=-1, keepdims=True)
    x = xc * jax.lax.rsqrt(var + 1e-5) * g_ref[...] + bt_ref[...]     # PyTorch eps

    # one wide MXU matmul for all fused projections (bf16 operands, f32 accum)
    y = jnp.dot(x.astype(jnp.bfloat16), w_ref[...],
                preferred_element_type=jnp.float32) + b_ref[...]      # (tl, nC*D)

    cos = cos_ref[...]
    sin_e = se_ref[...]
    sin_o = so_ref[...]

    for c, o_ref in enumerate(out_refs):
        chunk = y[:, c * D:(c + 1) * D]                               # (tl, D) f32
        if c < n_rope:
            # interleaved RoPE: out[2i]   = x[2i]*cos - x[2i+1]*sin
            #                   out[2i+1] = x[2i+1]*cos + x[2i]*sin
            nxt = pltpu.roll(chunk, D - 1, 1)        # chunk[:, d+1]
            prv = pltpu.roll(chunk, 1, 1)            # chunk[:, d-1]
            chunk = chunk * cos + nxt * sin_e + prv * sin_o
        o_ref[0] = chunk.astype(o_ref.dtype)         # single lane-dense store


def ln_proj_rope(x, gamma, beta, w, b, cos, sin_e, sin_o, *, n_chunks, n_rope):
    B, L, D = x.shape
    N = n_chunks * D
    tl = _row_tile(L)
    kernel = functools.partial(_proj_kernel, n_rope=n_rope)
    outs = pl.pallas_call(
        kernel,
        out_shape=tuple(jax.ShapeDtypeStruct((B, L, D), jnp.bfloat16)
                        for _ in range(n_chunks)),
        grid=(B, L // tl),
        in_specs=[
            pl.BlockSpec((1, tl, D), lambda bi, li: (bi, li, 0)),   # x rows
            pl.BlockSpec((1, D), lambda bi, li: (0, 0)),            # ln gamma
            pl.BlockSpec((1, D), lambda bi, li: (0, 0)),            # ln beta
            pl.BlockSpec((D, N), lambda bi, li: (0, 0)),            # fused weight (bf16)
            pl.BlockSpec((1, N), lambda bi, li: (0, 0)),            # fused bias (f32)
            pl.BlockSpec((tl, D), lambda bi, li: (li, 0)),          # rope cos rows
            pl.BlockSpec((tl, D), lambda bi, li: (li, 0)),          # rope sin (even lanes)
            pl.BlockSpec((tl, D), lambda bi, li: (li, 0)),          # rope sin (odd lanes)
        ],
        out_specs=tuple(pl.BlockSpec((1, tl, D), lambda bi, li: (bi, li, 0))
                        for _ in range(n_chunks)),
        compiler_params=pltpu.CompilerParams(
            dimension_semantics=("parallel", "parallel"),
            vmem_limit_bytes=_VMEM_LIMIT),
    )(x, gamma.reshape(1, D), beta.reshape(1, D), w,
      b.reshape(1, N).astype(jnp.float32), cos, sin_e, sin_o)
    if not isinstance(outs, (tuple, list)):
        outs = (outs,)
    return tuple(outs)


# ---------------------------------------------------------------------------
# Kernel 3: fused cross-attention projections
#   q = RoPE(LN2(x) @ Wq_scaled + bq_scaled)
#   k = RoPE(context @ Wk + bk),   v = context @ Wv + bv
# ---------------------------------------------------------------------------

def _cross_proj_kernel(x_ref, g_ref, bt_ref, wq_ref, bq_ref, ct_ref, ste_ref, sto_ref,
                       ctx_ref, wkv_ref, bkv_ref, cs_ref, sse_ref, sso_ref,
                       q_ref, k_ref, v_ref):
    D = x_ref.shape[2]

    # ---- q path: LN2(x) @ Wq (scale pre-folded) + RoPE over T positions ----
    x = x_ref[0].astype(jnp.float32)
    mu = jnp.mean(x, axis=-1, keepdims=True)
    xc = x - mu
    var = jnp.mean(xc * xc, axis=-1, keepdims=True)
    xn = xc * jax.lax.rsqrt(var + 1e-5) * g_ref[...] + bt_ref[...]
    qv = jnp.dot(xn.astype(jnp.bfloat16), wq_ref[...],
                 preferred_element_type=jnp.float32) + bq_ref[...]
    qv = (qv * ct_ref[...]
          + pltpu.roll(qv, D - 1, 1) * ste_ref[...]
          + pltpu.roll(qv, 1, 1) * sto_ref[...])
    q_ref[0] = qv.astype(q_ref.dtype)

    # ---- k/v path: context @ [Wk|Wv] + bias, RoPE on k over S positions ----
    c = ctx_ref[0].astype(jnp.float32)
    kv = jnp.dot(c.astype(jnp.bfloat16), wkv_ref[...],
                 preferred_element_type=jnp.float32) + bkv_ref[...]
    kk = kv[:, :D]
    kk = (kk * cs_ref[...]
          + pltpu.roll(kk, D - 1, 1) * sse_ref[...]
          + pltpu.roll(kk, 1, 1) * sso_ref[...])
    k_ref[0] = kk.astype(k_ref.dtype)
    v_ref[0] = kv[:, D:].astype(v_ref.dtype)


def cross_proj(x, gamma, beta, wq, bq, cos_t, ste, sto,
               context, wkv, bkv, cos_s, sse, sso):
    B, T, D = x.shape
    S = context.shape[1]
    return pl.pallas_call(
        _cross_proj_kernel,
        out_shape=(jax.ShapeDtypeStruct((B, T, D), jnp.bfloat16),
                   jax.ShapeDtypeStruct((B, S, D), jnp.bfloat16),
                   jax.ShapeDtypeStruct((B, S, D), jnp.bfloat16)),
        grid=(B,),
        in_specs=[
            pl.BlockSpec((1, T, D), lambda b: (b, 0, 0)),     # x
            pl.BlockSpec((1, D), lambda b: (0, 0)),           # ln2 gamma
            pl.BlockSpec((1, D), lambda b: (0, 0)),           # ln2 beta
            pl.BlockSpec((D, D), lambda b: (0, 0)),           # Wq (bf16, scaled)
            pl.BlockSpec((1, D), lambda b: (0, 0)),           # bq (scaled)
            pl.BlockSpec((T, D), lambda b: (0, 0)),           # cos (T)
            pl.BlockSpec((T, D), lambda b: (0, 0)),           # sin even (T)
            pl.BlockSpec((T, D), lambda b: (0, 0)),           # sin odd (T)
            pl.BlockSpec((1, S, D), lambda b: (b, 0, 0)),     # context
            pl.BlockSpec((D, 2 * D), lambda b: (0, 0)),       # [Wk|Wv] (bf16)
            pl.BlockSpec((1, 2 * D), lambda b: (0, 0)),       # [bk|bv]
            pl.BlockSpec((S, D), lambda b: (0, 0)),           # cos (S)
            pl.BlockSpec((S, D), lambda b: (0, 0)),           # sin even (S)
            pl.BlockSpec((S, D), lambda b: (0, 0)),           # sin odd (S)
        ],
        out_specs=(pl.BlockSpec((1, T, D), lambda b: (b, 0, 0)),
                   pl.BlockSpec((1, S, D), lambda b: (b, 0, 0)),
                   pl.BlockSpec((1, S, D), lambda b: (b, 0, 0))),
        compiler_params=pltpu.CompilerParams(
            dimension_semantics=("parallel",),
            vmem_limit_bytes=_VMEM_LIMIT),
    )(x, gamma.reshape(1, D), beta.reshape(1, D), wq,
      bq.reshape(1, D).astype(jnp.float32), cos_t, ste, sto,
      context, wkv, bkv.reshape(1, 2 * D).astype(jnp.float32), cos_s, sse, sso)


# ---------------------------------------------------------------------------
# Kernel 2/4: attention (all heads per step) + single out-projection + residual
# ---------------------------------------------------------------------------

def _attn_kernel(q_ref, k_ref, v_ref, bias_ref, wo_ref, bo_ref, res_ref, o_ref, *,
                 n_heads):
    # q_ref: (1, tt, D) bf16   k/v_ref: (1, S, D) bf16 (lane-dense, heads packed)
    # bias_ref: (1, 1, S) f32  wo_ref: (D, D) bf16      bo_ref: (1, D) f32
    # res_ref/o_ref: (1, tt, D) f32
    # NOTE: the 1/sqrt(Dh) softmax scale is pre-folded into Wq/bq upstream.
    D = q_ref.shape[2]
    Dh = D // n_heads

    bias = bias_ref[0]                                         # (1, S) f32, bcast over T
    q = q_ref[0]
    k = k_ref[0]
    v = v_ref[0]

    heads = []
    for h in range(n_heads):
        qh = q[:, h * Dh:(h + 1) * Dh]                         # (T, Dh) bf16
        kh = k[:, h * Dh:(h + 1) * Dh]                         # (S, Dh) bf16
        vh = v[:, h * Dh:(h + 1) * Dh]                         # (S, Dh) bf16
        # q @ k^T without materializing the transpose
        s = jax.lax.dot_general(qh, kh, (((1,), (1,)), ((), ())),
                                preferred_element_type=jnp.float32)
        s = s + bias                                           # (T, S) f32
        m = jnp.max(s, axis=-1, keepdims=True)
        p = jnp.exp(s - m)
        l = jnp.sum(p, axis=-1, keepdims=True)
        p = p * pl.reciprocal(l, approx=True)
        oh = jnp.dot(p.astype(vh.dtype), vh,
                     preferred_element_type=jnp.float32)       # (T, Dh)
        heads.append(oh.astype(jnp.bfloat16))

    # one full-D MXU matmul against Wo (instead of H Dh-contraction matmuls)
    attn = jnp.concatenate(heads, axis=-1)                     # (T, D) bf16, lane-dense
    out = jnp.dot(attn, wo_ref[...], preferred_element_type=jnp.float32)
    o_ref[0] = (out + bo_ref[...] + res_ref[0].astype(jnp.float32)).astype(o_ref.dtype)


def attention_block(q, k, v, bias, wo_bf16, bo, resid, n_heads):
    B, T, D = resid.shape
    S = k.shape[1]
    tt = _row_tile(T)
    kernel = functools.partial(_attn_kernel, n_heads=n_heads)
    return pl.pallas_call(
        kernel,
        out_shape=jax.ShapeDtypeStruct((B, T, D), resid.dtype),
        grid=(B, T // tt),
        in_specs=[
            pl.BlockSpec((1, tt, D), lambda b, ti: (b, ti, 0)),   # q (query tile)
            pl.BlockSpec((1, S, D), lambda b, ti: (b, 0, 0)),     # k (full S)
            pl.BlockSpec((1, S, D), lambda b, ti: (b, 0, 0)),     # v (full S)
            pl.BlockSpec((1, 1, S), lambda b, ti: (b, 0, 0)),     # additive mask bias
            pl.BlockSpec((D, D), lambda b, ti: (0, 0)),           # Wo (bf16)
            pl.BlockSpec((1, D), lambda b, ti: (0, 0)),           # bo
            pl.BlockSpec((1, tt, D), lambda b, ti: (b, ti, 0)),   # residual
        ],
        out_specs=pl.BlockSpec((1, tt, D), lambda b, ti: (b, ti, 0)),
        compiler_params=pltpu.CompilerParams(
            dimension_semantics=("parallel", "parallel"),
            vmem_limit_bytes=_VMEM_LIMIT),
    )(q, k, v, bias, wo_bf16, bo.reshape(1, D).astype(jnp.float32), resid)


# ---------------------------------------------------------------------------
# Kernel 5: LayerNorm + FFN (tiled rows x hidden) + residual
# ---------------------------------------------------------------------------

def _ffn_kernel(x_ref, g_ref, bt_ref, w1_ref, b1_ref, w2_ref, b2_ref, o_ref,
                ln_ref, acc_ref):
    @pl.when(pl.program_id(1) == 0)
    def _():
        x = x_ref[...].astype(jnp.float32)
        mu = jnp.mean(x, axis=-1, keepdims=True)
        xc = x - mu
        var = jnp.mean(xc * xc, axis=-1, keepdims=True)
        ln_ref[...] = xc * jax.lax.rsqrt(var + 1e-5) * g_ref[...] + bt_ref[...]
        acc_ref[...] = jnp.zeros_like(acc_ref)

    hidden = jnp.dot(ln_ref[...].astype(jnp.bfloat16), w1_ref[...],
                     preferred_element_type=jnp.float32) + b1_ref[...]
    hidden = jnp.maximum(hidden, 0.0)                              # ReLU
    acc_ref[...] += jnp.dot(hidden.astype(jnp.bfloat16), w2_ref[...],
                            preferred_element_type=jnp.float32)

    @pl.when(pl.program_id(1) == pl.num_programs(1) - 1)
    def _():
        o_ref[...] = (acc_ref[...] + b2_ref[...]
                      + x_ref[...].astype(jnp.float32)).astype(o_ref.dtype)


def ffn_block(x, gamma, beta, w1_bf16, b1, w2_bf16, b2):
    B, T, D = x.shape
    M = B * T
    Hf = w1_bf16.shape[1]
    x2 = x.reshape(M, D)
    tm = _row_tile(M)
    th = _col_tile(Hf, cap=_FFN_COL_CAP)
    grid = (M // tm, Hf // th)
    out = pl.pallas_call(
        _ffn_kernel,
        out_shape=jax.ShapeDtypeStruct((M, D), x.dtype),
        grid=grid,
        in_specs=[
            pl.BlockSpec((tm, D), lambda i, h: (i, 0)),    # x (rows, resident over h)
            pl.BlockSpec((1, D), lambda i, h: (0, 0)),     # ln gamma
            pl.BlockSpec((1, D), lambda i, h: (0, 0)),     # ln beta
            pl.BlockSpec((D, th), lambda i, h: (0, h)),    # W1 column tile (bf16)
            pl.BlockSpec((1, th), lambda i, h: (0, h)),    # b1 tile
            pl.BlockSpec((th, D), lambda i, h: (h, 0)),    # W2 row tile (bf16)
            pl.BlockSpec((1, D), lambda i, h: (0, 0)),     # b2
        ],
        out_specs=pl.BlockSpec((tm, D), lambda i, h: (i, 0)),
        scratch_shapes=[pltpu.VMEM((tm, D), jnp.float32),   # LN(x) tile
                        pltpu.VMEM((tm, D), jnp.float32)],  # f32 accumulator
        compiler_params=pltpu.CompilerParams(
            dimension_semantics=("parallel", "arbitrary"),
            vmem_limit_bytes=_VMEM_LIMIT),
    )(x2, gamma.reshape(1, D), beta.reshape(1, D),
      w1_bf16, b1.reshape(1, Hf).astype(jnp.float32),
      w2_bf16, b2.reshape(1, D).astype(jnp.float32))
    return out.reshape(B, T, D)


# ---------------------------------------------------------------------------
# Plain-JAX glue: RoPE tables, mask bias, parameter fusion
# ---------------------------------------------------------------------------

def _rope_tables(L, D, n_heads, base=10000.0):
    # torchtune interleaved-pair convention laid out over the full D lanes,
    # with parity pre-folded into two sin tables (sin_e on even lanes carries
    # the -sin term for the d+1 partner, sin_o on odd lanes carries +sin for d-1).
    Dh = D // n_heads
    d = jnp.arange(D)
    pair = (d % Dh) // 2
    inv_freq = 1.0 / (base ** (2.0 * pair.astype(jnp.float32) / Dh))
    pos = jnp.arange(L, dtype=jnp.float32)
    ang = pos[:, None] * inv_freq[None, :]                    # (L, D)
    cos = jnp.cos(ang)
    sin = jnp.sin(ang)
    even = (d % 2 == 0)[None, :]
    sin_e = jnp.where(even, -sin, 0.0)
    sin_o = jnp.where(even, 0.0, sin)
    return (cos.astype(jnp.float32), sin_e.astype(jnp.float32),
            sin_o.astype(jnp.float32))


def decoder_layer(params, x, context, decoder_mask, encoder_mask, n_heads):
    B, T, D = x.shape
    S = context.shape[1]
    Dh = D // n_heads
    bf16 = jnp.bfloat16
    scale = 1.0 / math.sqrt(Dh)            # folded into Wq / bq (RoPE commutes)

    cos_t, ste, sto = _rope_tables(T, D, n_heads)
    cos_s, sse, sso = _rope_tables(S, D, n_heads)

    # boolean key-padding masks -> additive f32 bias
    dec_bias = jnp.where(decoder_mask, 0.0, -1e30).astype(jnp.float32).reshape(B, 1, T)
    enc_bias = jnp.where(encoder_mask, 0.0, -1e30).astype(jnp.float32).reshape(B, 1, S)

    sa, ca = params["self_attn"], params["cross_attn"]

    # ---- self-attention block: x = x + SelfAttn(LN1(x)) ----
    w_qkv = jnp.concatenate([sa["wq"] * scale, sa["wk"], sa["wv"]], axis=1).astype(bf16)
    b_qkv = jnp.concatenate([sa["bq"] * scale, sa["bk"], sa["bv"]])
    q, k, v = ln_proj_rope(x, params["ln1_g"], params["ln1_b"], w_qkv, b_qkv,
                           cos_t, ste, sto, n_chunks=3, n_rope=2)
    x = attention_block(q, k, v, dec_bias, sa["wo"].astype(bf16), sa["bo"], x, n_heads)

    # ---- cross-attention block: x = x + CrossAttn(LN2(x), context) ----
    # (reference applies RoPE to cross-attention keys as well; no LN on the context)
    w_kv = jnp.concatenate([ca["wk"], ca["wv"]], axis=1).astype(bf16)
    b_kv = jnp.concatenate([ca["bk"], ca["bv"]])
    q, k, v = cross_proj(x, params["ln2_g"], params["ln2_b"],
                         (ca["wq"] * scale).astype(bf16), ca["bq"] * scale,
                         cos_t, ste, sto, context, w_kv, b_kv, cos_s, sse, sso)
    x = attention_block(q, k, v, enc_bias, ca["wo"].astype(bf16), ca["bo"], x, n_heads)

    # ---- FFN block: x = x + FFN(LN3(x)) ----
    x = ffn_block(x, params["ln3_g"], params["ln3_b"],
                  params["ff_w1"].astype(bf16), params["ff_b1"],
                  params["ff_w2"].astype(bf16), params["ff_b2"])
    return x   # dropout layers are identity in eval mode


# ---------------------------------------------------------------------------
# Parameter init (weights stored as (d_in, d_out), matching x @ W + b)
# ---------------------------------------------------------------------------

def init_linear(key, d_in, d_out):
    kw, kb = jax.random.split(key)
    w = jax.random.normal(kw, (d_in, d_out), jnp.float32) * (1.0 / math.sqrt(d_in))
    b = jax.random.normal(kb, (d_out,), jnp.float32) * 0.02
    return w, b


def init_mha(key, d_model):
    ks = jax.random.split(key, 4)
    wq, bq = init_linear(ks[0], d_model, d_model)
    wk, bk = init_linear(ks[1], d_model, d_model)
    wv, bv = init_linear(ks[2], d_model, d_model)
    wo, bo = init_linear(ks[3], d_model, d_model)
    return dict(wq=wq, bq=bq, wk=wk, bk=bk, wv=wv, bv=bv, wo=wo, bo=bo)


def init_params(key, d_model):
    ks = jax.random.split(key, 4)
    w1, b1 = init_linear(ks[2], d_model, 4 * d_model)
    w2, b2 = init_linear(ks[3], 4 * d_model, d_model)
    return dict(
        self_attn=init_mha(ks[0], d_model),
        cross_attn=init_mha(ks[1], d_model),
        ff_w1=w1, ff_b1=b1, ff_w2=w2, ff_b2=b2,
        ln1_g=jnp.ones((d_model,), jnp.float32), ln1_b=jnp.zeros((d_model,), jnp.float32),
        ln2_g=jnp.ones((d_model,), jnp.float32), ln2_b=jnp.zeros((d_model,), jnp.float32),
        ln3_g=jnp.ones((d_model,), jnp.float32), ln3_b=jnp.zeros((d_model,), jnp.float32),
    )


if __name__ == "__main__":
    B, T, S, D, H = 2, 8, 16, 32, 4          # batch, dec seq, enc seq, d_model, n_heads

    key = jax.random.PRNGKey(0)
    kp, kx, kc = jax.random.split(key, 3)
    params = init_params(kp, D)

    x = jax.random.normal(kx, (B, T, D), jnp.float32)
    context = jax.random.normal(kc, (B, S, D), jnp.float32)

    # boolean key-padding masks (True = attend); batch 1 has trailing padding
    dec_lens = jnp.array([T, 6])
    enc_lens = jnp.array([S, 12])
    decoder_mask = (jnp.arange(T)[None, :] < dec_lens[:, None])
    encoder_mask = (jnp.arange(S)[None, :] < enc_lens[:, None])

    layer = jax.jit(functools.partial(decoder_layer, n_heads=H))
    out = layer(params, x, context, decoder_mask, encoder_mask)
    out = jax.block_until_ready(out)

    assert out.shape == (B, T, D)
    assert bool(jnp.all(jnp.isfinite(out)))
    print("KERNEL_OK")
</pallas_src>

<mosaic_0001>
module attributes {stable_mosaic.version = 11 : i64} {
  func.func @_proj_kernel(%arg0: i32, %arg1: i32, %arg2: memref<1x8x32xf32, #tpu.memory_space<vmem>>, %arg3: memref<1x32xf32, #tpu.memory_space<vmem>>, %arg4: memref<1x32xf32, #tpu.memory_space<vmem>>, %arg5: memref<32x96xbf16, #tpu.memory_space<vmem>>, %arg6: memref<1x96xf32, #tpu.memory_space<vmem>>, %arg7: memref<8x32xf32, #tpu.memory_space<vmem>>, %arg8: memref<8x32xf32, #tpu.memory_space<vmem>>, %arg9: memref<8x32xf32, #tpu.memory_space<vmem>>, %arg10: memref<1x8x32xbf16, #tpu.memory_space<vmem>>, %arg11: memref<1x8x32xbf16, #tpu.memory_space<vmem>>, %arg12: memref<1x8x32xbf16, #tpu.memory_space<vmem>>) attributes {dimension_semantics = [#tpu.dimension_semantics<parallel>, #tpu.dimension_semantics<parallel>], iteration_bounds = array<i64: 2, 1>, scalar_prefetch = 0 : i64, scratch_operands = 0 : i64, tpu.core_type = #tpu.core_type<tc>, window_params = [{transform_indices = @transform_0, window_bounds = array<i64: 1, 8, 32>}, {pipeline_mode = #tpu.pipeline_mode<synchronous>, transform_indices = @transform_1, window_bounds = array<i64: 1, 32>}, {pipeline_mode = #tpu.pipeline_mode<synchronous>, transform_indices = @transform_2, window_bounds = array<i64: 1, 32>}, {pipeline_mode = #tpu.pipeline_mode<synchronous>, transform_indices = @transform_3, window_bounds = array<i64: 32, 96>}, {pipeline_mode = #tpu.pipeline_mode<synchronous>, transform_indices = @transform_4, window_bounds = array<i64: 1, 96>}, {transform_indices = @transform_5, window_bounds = array<i64: 8, 32>}, {transform_indices = @transform_6, window_bounds = array<i64: 8, 32>}, {transform_indices = @transform_7, window_bounds = array<i64: 8, 32>}, {transform_indices = @transform_8, window_bounds = array<i64: 1, 8, 32>}, {transform_indices = @transform_9, window_bounds = array<i64: 1, 8, 32>}, {transform_indices = @transform_10, window_bounds = array<i64: 1, 8, 32>}]} {
    %c0 = arith.constant 0 : index
    %c0_0 = arith.constant 0 : index
    %c0_1 = arith.constant 0 : index
    %0 = vector.load %arg2[%c0, %c0_0, %c0_1] : memref<1x8x32xf32, #tpu.memory_space<vmem>>, vector<1x8x32xf32>
    %1 = vector.shape_cast %0 : vector<1x8x32xf32> to vector<8x32xf32>
    %cst = arith.constant dense<0.000000e+00> : vector<8xf32>
    %2 = vector.multi_reduction <add>, %1, %cst [1] : vector<8x32xf32> to vector<8xf32>
    %3 = vector.shape_cast %2 : vector<8xf32> to vector<8x1xf32>
    %cst_2 = arith.constant 3.200000e+01 : f32
    %4 = vector.broadcast %cst_2 : f32 to vector<8x1xf32>
    %5 = arith.divf %3, %4 : vector<8x1xf32>
    %6 = vector.broadcast %5 : vector<8x1xf32> to vector<8x32xf32>
    %7 = arith.subf %1, %6 : vector<8x32xf32>
    %8 = arith.mulf %7, %7 : vector<8x32xf32>
    %cst_3 = arith.constant dense<0.000000e+00> : vector<8xf32>
    %9 = vector.multi_reduction <add>, %8, %cst_3 [1] : vector<8x32xf32> to vector<8xf32>
    %10 = vector.shape_cast %9 : vector<8xf32> to vector<8x1xf32>
    %cst_4 = arith.constant 3.200000e+01 : f32
    %11 = vector.broadcast %cst_4 : f32 to vector<8x1xf32>
    %12 = arith.divf %10, %11 : vector<8x1xf32>
    %cst_5 = arith.constant 9.99999974E-6 : f32
    %13 = vector.broadcast %cst_5 : f32 to vector<8x1xf32>
    %14 = arith.addf %12, %13 : vector<8x1xf32>
    %15 = math.rsqrt %14 : vector<8x1xf32>
    %16 = vector.broadcast %15 : vector<8x1xf32> to vector<8x32xf32>
    %17 = arith.mulf %7, %16 : vector<8x32xf32>
    %c0_6 = arith.constant 0 : index
    %c0_7 = arith.constant 0 : index
    %18 = vector.load %arg3[%c0_6, %c0_7] : memref<1x32xf32, #tpu.memory_space<vmem>>, vector<1x32xf32>
    %19 = vector.broadcast %18 : vector<1x32xf32> to vector<8x32xf32>
    %20 = arith.mulf %17, %19 : vector<8x32xf32>
    %c0_8 = arith.constant 0 : index
    %c0_9 = arith.constant 0 : index
    %21 = vector.load %arg4[%c0_8, %c0_9] : memref<1x32xf32, #tpu.memory_space<vmem>>, vector<1x32xf32>
    %22 = vector.broadcast %21 : vector<1x32xf32> to vector<8x32xf32>
    %23 = arith.addf %20, %22 : vector<8x32xf32>
    %24 = arith.truncf %23 : vector<8x32xf32> to vector<8x32xbf16>
    %c0_10 = arith.constant 0 : index
    %c0_11 = arith.constant 0 : index
    %25 = vector.load %arg5[%c0_10, %c0_11] : memref<32x96xbf16, #tpu.memory_space<vmem>>, vector<32x96xbf16>
    %cst_12 = arith.constant dense<0.000000e+00> : vector<8x96xf32>
    %26 = tpu.matmul %24, %25, %cst_12 {dimension_numbers = #tpu.dot_dimension_numbers<[1], [0], [0], [1], [0, 0, 1, 1], [], []>} : vector<8x32xbf16>, vector<32x96xbf16>, vector<8x96xf32> -> vector<8x96xf32>
    %c0_13 = arith.constant 0 : index
    %c0_14 = arith.constant 0 : index
    %27 = vector.load %arg6[%c0_13, %c0_14] : memref<1x96xf32, #tpu.memory_space<vmem>>, vector<1x96xf32>
    %28 = vector.broadcast %27 : vector<1x96xf32> to vector<8x96xf32>
    %29 = arith.addf %26, %28 : vector<8x96xf32>
    %c0_15 = arith.constant 0 : index
    %c0_16 = arith.constant 0 : index
    %30 = vector.load %arg7[%c0_15, %c0_16] : memref<8x32xf32, #tpu.memory_space<vmem>>, vector<8x32xf32>
    %c0_17 = arith.constant 0 : index
    %c0_18 = arith.constant 0 : index
    %31 = vector.load %arg8[%c0_17, %c0_18] : memref<8x32xf32, #tpu.memory_space<vmem>>, vector<8x32xf32>
    %c0_19 = arith.constant 0 : index
    %c0_20 = arith.constant 0 : index
    %32 = vector.load %arg9[%c0_19, %c0_20] : memref<8x32xf32, #tpu.memory_space<vmem>>, vector<8x32xf32>
    %33 = vector.extract_strided_slice %29 {offsets = [0, 0], sizes = [8, 32], strides = [1, 1]} : vector<8x96xf32> to vector<8x32xf32>
    %c31_i32 = arith.constant 31 : i32
    %34 = tpu.dynamic_rotate %33 by %c31_i32 dim 1 : vector<8x32xf32>, i32 -> vector<8x32xf32>
    %c1_i32 = arith.constant 1 : i32
    %35 = tpu.dynamic_rotate %33 by %c1_i32 dim 1 : vector<8x32xf32>, i32 -> vector<8x32xf32>
    %36 = arith.mulf %33, %30 : vector<8x32xf32>
    %37 = arith.mulf %34, %31 : vector<8x32xf32>
    %38 = arith.addf %36, %37 : vector<8x32xf32>
    %39 = arith.mulf %35, %32 : vector<8x32xf32>
    %40 = arith.addf %38, %39 : vector<8x32xf32>
    %41 = arith.truncf %40 : vector<8x32xf32> to vector<8x32xbf16>
    %c0_21 = arith.constant 0 : index
    %c0_22 = arith.constant 0 : index
    %c0_23 = arith.constant 0 : index
    %42 = vector.load %arg10[%c0_21, %c0_22, %c0_23] : memref<1x8x32xbf16, #tpu.memory_space<vmem>>, vector<1x8x32xbf16>
    %43 = vector.shape_cast %42 : vector<1x8x32xbf16> to vector<8x32xbf16>
    %44 = vector.shape_cast %41 : vector<8x32xbf16> to vector<1x8x32xbf16>
    tpu.vector_store %arg10[%c0_21, %c0_22, %c0_23], %44 {strides = array<i32>} : memref<1x8x32xbf16, #tpu.memory_space<vmem>>, vector<1x8x32xbf16>,
    %45 = vector.extract_strided_slice %29 {offsets = [0, 32], sizes = [8, 32], strides = [1, 1]} : vector<8x96xf32> to vector<8x32xf32>
    %c31_i32_24 = arith.constant 31 : i32
    %46 = tpu.dynamic_rotate %45 by %c31_i32_24 dim 1 : vector<8x32xf32>, i32 -> vector<8x32xf32>
    %c1_i32_25 = arith.constant 1 : i32
    %47 = tpu.dynamic_rotate %45 by %c1_i32_25 dim 1 : vector<8x32xf32>, i32 -> vector<8x32xf32>
    %48 = arith.mulf %45, %30 : vector<8x32xf32>
    %49 = arith.mulf %46, %31 : vector<8x32xf32>
    %50 = arith.addf %48, %49 : vector<8x32xf32>
    %51 = arith.mulf %47, %32 : vector<8x32xf32>
    %52 = arith.addf %50, %51 : vector<8x32xf32>
    %53 = arith.truncf %52 : vector<8x32xf32> to vector<8x32xbf16>
    %c0_26 = arith.constant 0 : index
    %c0_27 = arith.constant 0 : index
    %c0_28 = arith.constant 0 : index
    %54 = vector.load %arg11[%c0_26, %c0_27, %c0_28] : memref<1x8x32xbf16, #tpu.memory_space<vmem>>, vector<1x8x32xbf16>
    %55 = vector.shape_cast %54 : vector<1x8x32xbf16> to vector<8x32xbf16>
    %56 = vector.shape_cast %53 : vector<8x32xbf16> to vector<1x8x32xbf16>
    tpu.vector_store %arg11[%c0_26, %c0_27, %c0_28], %56 {strides = array<i32>} : memref<1x8x32xbf16, #tpu.memory_space<vmem>>, vector<1x8x32xbf16>,
    %57 = vector.extract_strided_slice %29 {offsets = [0, 64], sizes = [8, 32], strides = [1, 1]} : vector<8x96xf32> to vector<8x32xf32>
    %58 = arith.truncf %57 : vector<8x32xf32> to vector<8x32xbf16>
    %c0_29 = arith.constant 0 : index
    %c0_30 = arith.constant 0 : index
    %c0_31 = arith.constant 0 : index
    %59 = vector.load %arg12[%c0_29, %c0_30, %c0_31] : memref<1x8x32xbf16, #tpu.memory_space<vmem>>, vector<1x8x32xbf16>
    %60 = vector.shape_cast %59 : vector<1x8x32xbf16> to vector<8x32xbf16>
    %61 = vector.shape_cast %58 : vector<8x32xbf16> to vector<1x8x32xbf16>
    tpu.vector_store %arg12[%c0_29, %c0_30, %c0_31], %61 {strides = array<i32>} : memref<1x8x32xbf16, #tpu.memory_space<vmem>>, vector<1x8x32xbf16>,
    return
  }
  func.func @transform_0(%arg0: i32, %arg1: i32) -> (i32, i32, i32) {
    %c0_i32 = arith.constant 0 : i32
    %c0_i32_0 = arith.constant 0 : i32
    return %arg0, %arg1, %c0_i32 : i32, i32, i32
  }
  func.func @transform_1(%arg0: i32, %arg1: i32) -> (i32, i32) {
    %c0_i32 = arith.constant 0 : i32
    %c0_i32_0 = arith.constant 0 : i32
    %c0_i32_1 = arith.constant 0 : i32
    return %c0_i32, %c0_i32_0 : i32, i32
  }
  func.func @transform_2(%arg0: i32, %arg1: i32) -> (i32, i32) {
    %c0_i32 = arith.constant 0 : i32
    %c0_i32_0 = arith.constant 0 : i32
    %c0_i32_1 = arith.constant 0 : i32
    return %c0_i32, %c0_i32_0 : i32, i32
  }
  func.func @transform_3(%arg0: i32, %arg1: i32) -> (i32, i32) {
    %c0_i32 = arith.constant 0 : i32
    %c0_i32_0 = arith.constant 0 : i32
    %c0_i32_1 = arith.constant 0 : i32
    return %c0_i32, %c0_i32_0 : i32, i32
  }
  func.func @transform_4(%arg0: i32, %arg1: i32) -> (i32, i32) {
    %c0_i32 = arith.constant 0 : i32
    %c0_i32_0 = arith.constant 0 : i32
    %c0_i32_1 = arith.constant 0 : i32
    return %c0_i32, %c0_i32_0 : i32, i32
  }
  func.func @transform_5(%arg0: i32, %arg1: i32) -> (i32, i32) {
    %c0_i32 = arith.constant 0 : i32
    %c0_i32_0 = arith.constant 0 : i32
    return %arg1, %c0_i32 : i32, i32
  }
  func.func @transform_6(%arg0: i32, %arg1: i32) -> (i32, i32) {
    %c0_i32 = arith.constant 0 : i32
    %c0_i32_0 = arith.constant 0 : i32
    return %arg1, %c0_i32 : i32, i32
  }
  func.func @transform_7(%arg0: i32, %arg1: i32) -> (i32, i32) {
    %c0_i32 = arith.constant 0 : i32
    %c0_i32_0 = arith.constant 0 : i32
    return %arg1, %c0_i32 : i32, i32
  }
  func.func @transform_8(%arg0: i32, %arg1: i32) -> (i32, i32, i32) {
    %c0_i32 = arith.constant 0 : i32
    %c0_i32_0 = arith.constant 0 : i32
    return %arg0, %arg1, %c0_i32 : i32, i32, i32
  }
  func.func @transform_9(%arg0: i32, %arg1: i32) -> (i32, i32, i32) {
    %c0_i32 = arith.constant 0 : i32
    %c0_i32_0 = arith.constant 0 : i32
    return %arg0, %arg1, %c0_i32 : i32, i32, i32
  }
  func.func @transform_10(%arg0: i32, %arg1: i32) -> (i32, i32, i32) {
    %c0_i32 = arith.constant 0 : i32
    %c0_i32_0 = arith.constant 0 : i32
    return %arg0, %arg1, %c0_i32 : i32, i32, i32
  }
}

module attributes {stable_mosaic.version = 11 : i64} {
  func.func @_attn_kernel(%arg0: i32, %arg1: i32, %arg2: memref<1x8x32xbf16, #tpu.memory_space<vmem>>, %arg3: memref<1x8x32xbf16, #tpu.memory_space<vmem>>, %arg4: memref<1x8x32xbf16, #tpu.memory_space<vmem>>, %arg5: memref<1x1x8xf32, #tpu.memory_space<vmem>>, %arg6: memref<32x32xbf16, #tpu.memory_space<vmem>>, %arg7: memref<1x32xf32, #tpu.memory_space<vmem>>, %arg8: memref<1x8x32xf32, #tpu.memory_space<vmem>>, %arg9: memref<1x8x32xf32, #tpu.memory_space<vmem>>) attributes {dimension_semantics = [#tpu.dimension_semantics<parallel>, #tpu.dimension_semantics<parallel>], iteration_bounds = array<i64: 2, 1>, scalar_prefetch = 0 : i64, scratch_operands = 0 : i64, tpu.core_type = #tpu.core_type<tc>, window_params = [{transform_indices = @transform_0, window_bounds = array<i64: 1, 8, 32>}, {transform_indices = @transform_1, window_bounds = array<i64: 1, 8, 32>}, {transform_indices = @transform_2, window_bounds = array<i64: 1, 8, 32>}, {transform_indices = @transform_3, window_bounds = array<i64: 1, 1, 8>}, {pipeline_mode = #tpu.pipeline_mode<synchronous>, transform_indices = @transform_4, window_bounds = array<i64: 32, 32>}, {pipeline_mode = #tpu.pipeline_mode<synchronous>, transform_indices = @transform_5, window_bounds = array<i64: 1, 32>}, {transform_indices = @transform_6, window_bounds = array<i64: 1, 8, 32>}, {transform_indices = @transform_7, window_bounds = array<i64: 1, 8, 32>}]} {
    %c0 = arith.constant 0 : index
    %c0_0 = arith.constant 0 : index
    %c0_1 = arith.constant 0 : index
    %0 = vector.load %arg5[%c0, %c0_0, %c0_1] : memref<1x1x8xf32, #tpu.memory_space<vmem>>, vector<1x1x8xf32>
    %1 = vector.shape_cast %0 : vector<1x1x8xf32> to vector<1x8xf32>
    %c0_2 = arith.constant 0 : index
    %c0_3 = arith.constant 0 : index
    %c0_4 = arith.constant 0 : index
    %2 = vector.load %arg2[%c0_2, %c0_3, %c0_4] : memref<1x8x32xbf16, #tpu.memory_space<vmem>>, vector<1x8x32xbf16>
    %3 = vector.shape_cast %2 : vector<1x8x32xbf16> to vector<8x32xbf16>
    %c0_5 = arith.constant 0 : index
    %c0_6 = arith.constant 0 : index
    %c0_7 = arith.constant 0 : index
    %4 = vector.load %arg3[%c0_5, %c0_6, %c0_7] : memref<1x8x32xbf16, #tpu.memory_space<vmem>>, vector<1x8x32xbf16>
    %5 = vector.shape_cast %4 : vector<1x8x32xbf16> to vector<8x32xbf16>
    %c0_8 = arith.constant 0 : index
    %c0_9 = arith.constant 0 : index
    %c0_10 = arith.constant 0 : index
    %6 = vector.load %arg4[%c0_8, %c0_9, %c0_10] : memref<1x8x32xbf16, #tpu.memory_space<vmem>>, vector<1x8x32xbf16>
    %7 = vector.shape_cast %6 : vector<1x8x32xbf16> to vector<8x32xbf16>
    %8 = vector.extract_strided_slice %3 {offsets = [0, 0], sizes = [8, 8], strides = [1, 1]} : vector<8x32xbf16> to vector<8x8xbf16>
    %9 = vector.extract_strided_slice %5 {offsets = [0, 0], sizes = [8, 8], strides = [1, 1]} : vector<8x32xbf16> to vector<8x8xbf16>
    %10 = vector.extract_strided_slice %7 {offsets = [0, 0], sizes = [8, 8], strides = [1, 1]} : vector<8x32xbf16> to vector<8x8xbf16>
    %cst = arith.constant dense<0.000000e+00> : vector<8x8xf32>
    %11 = tpu.matmul %8, %9, %cst {dimension_numbers = #tpu.dot_dimension_numbers<[1], [1], [0], [0], [0, 0, 1, 0], [], []>} : vector<8x8xbf16>, vector<8x8xbf16>, vector<8x8xf32> -> vector<8x8xf32>
    %12 = vector.broadcast %1 : vector<1x8xf32> to vector<8x8xf32>
    %13 = arith.addf %11, %12 : vector<8x8xf32>
    %cst_11 = arith.constant dense<0xFF800000> : vector<8xf32>
    %14 = vector.multi_reduction <maximumf>, %13, %cst_11 [1] : vector<8x8xf32> to vector<8xf32>
    %15 = vector.shape_cast %14 : vector<8xf32> to vector<8x1xf32>
    %16 = vector.broadcast %15 : vector<8x1xf32> to vector<8x8xf32>
    %17 = arith.subf %13, %16 : vector<8x8xf32>
    %18 = math.exp %17 : vector<8x8xf32>
    %cst_12 = arith.constant dense<0.000000e+00> : vector<8xf32>
    %19 = vector.multi_reduction <add>, %18, %cst_12 [1] : vector<8x8xf32> to vector<8xf32>
    %20 = vector.shape_cast %19 : vector<8xf32> to vector<8x1xf32>
    %21 = tpu.reciprocal %20 {approx = true} : vector<8x1xf32> -> vector<8x1xf32>
    %22 = vector.broadcast %21 : vector<8x1xf32> to vector<8x8xf32>
    %23 = arith.mulf %18, %22 : vector<8x8xf32>
    %24 = arith.truncf %23 : vector<8x8xf32> to vector<8x8xbf16>
    %cst_13 = arith.constant dense<0.000000e+00> : vector<8x8xf32>
    %25 = tpu.matmul %24, %10, %cst_13 {dimension_numbers = #tpu.dot_dimension_numbers<[1], [0], [0], [1], [0, 0, 1, 1], [], []>} : vector<8x8xbf16>, vector<8x8xbf16>, vector<8x8xf32> -> vector<8x8xf32>
    %26 = arith.truncf %25 : vector<8x8xf32> to vector<8x8xbf16>
    %27 = vector.extract_strided_slice %3 {offsets = [0, 8], sizes = [8, 8], strides = [1, 1]} : vector<8x32xbf16> to vector<8x8xbf16>
    %28 = vector.extract_strided_slice %5 {offsets = [0, 8], sizes = [8, 8], strides = [1, 1]} : vector<8x32xbf16> to vector<8x8xbf16>
    %29 = vector.extract_strided_slice %7 {offsets = [0, 8], sizes = [8, 8], strides = [1, 1]} : vector<8x32xbf16> to vector<8x8xbf16>
    %cst_14 = arith.constant dense<0.000000e+00> : vector<8x8xf32>
    %30 = tpu.matmul %27, %28, %cst_14 {dimension_numbers = #tpu.dot_dimension_numbers<[1], [1], [0], [0], [0, 0, 1, 0], [], []>} : vector<8x8xbf16>, vector<8x8xbf16>, vector<8x8xf32> -> vector<8x8xf32>
    %31 = vector.broadcast %1 : vector<1x8xf32> to vector<8x8xf32>
    %32 = arith.addf %30, %31 : vector<8x8xf32>
    %cst_15 = arith.constant dense<0xFF800000> : vector<8xf32>
    %33 = vector.multi_reduction <maximumf>, %32, %cst_15 [1] : vector<8x8xf32> to vector<8xf32>
    %34 = vector.shape_cast %33 : vector<8xf32> to vector<8x1xf32>
    %35 = vector.broadcast %34 : vector<8x1xf32> to vector<8x8xf32>
    %36 = arith.subf %32, %35 : vector<8x8xf32>
    %37 = math.exp %36 : vector<8x8xf32>
    %cst_16 = arith.constant dense<0.000000e+00> : vector<8xf32>
    %38 = vector.multi_reduction <add>, %37, %cst_16 [1] : vector<8x8xf32> to vector<8xf32>
    %39 = vector.shape_cast %38 : vector<8xf32> to vector<8x1xf32>
    %40 = tpu.reciprocal %39 {approx = true} : vector<8x1xf32> -> vector<8x1xf32>
    %41 = vector.broadcast %40 : vector<8x1xf32> to vector<8x8xf32>
    %42 = arith.mulf %37, %41 : vector<8x8xf32>
    %43 = arith.truncf %42 : vector<8x8xf32> to vector<8x8xbf16>
    %cst_17 = arith.constant dense<0.000000e+00> : vector<8x8xf32>
    %44 = tpu.matmul %43, %29, %cst_17 {dimension_numbers = #tpu.dot_dimension_numbers<[1], [0], [0], [1], [0, 0, 1, 1], [], []>} : vector<8x8xbf16>, vector<8x8xbf16>, vector<8x8xf32> -> vector<8x8xf32>
    %45 = arith.truncf %44 : vector<8x8xf32> to vector<8x8xbf16>
    %46 = vector.extract_strided_slice %3 {offsets = [0, 16], sizes = [8, 8], strides = [1, 1]} : vector<8x32xbf16> to vector<8x8xbf16>
    %47 = vector.extract_strided_slice %5 {offsets = [0, 16], sizes = [8, 8], strides = [1, 1]} : vector<8x32xbf16> to vector<8x8xbf16>
    %48 = vector.extract_strided_slice %7 {offsets = [0, 16], sizes = [8, 8], strides = [1, 1]} : vector<8x32xbf16> to vector<8x8xbf16>
    %cst_18 = arith.constant dense<0.000000e+00> : vector<8x8xf32>
    %49 = tpu.matmul %46, %47, %cst_18 {dimension_numbers = #tpu.dot_dimension_numbers<[1], [1], [0], [0], [0, 0, 1, 0], [], []>} : vector<8x8xbf16>, vector<8x8xbf16>, vector<8x8xf32> -> vector<8x8xf32>
    %50 = vector.broadcast %1 : vector<1x8xf32> to vector<8x8xf32>
    %51 = arith.addf %49, %50 : vector<8x8xf32>
    %cst_19 = arith.constant dense<0xFF800000> : vector<8xf32>
    %52 = vector.multi_reduction <maximumf>, %51, %cst_19 [1] : vector<8x8xf32> to vector<8xf32>
    %53 = vector.shape_cast %52 : vector<8xf32> to vector<8x1xf32>
    %54 = vector.broadcast %53 : vector<8x1xf32> to vector<8x8xf32>
    %55 = arith.subf %51, %54 : vector<8x8xf32>
    %56 = math.exp %55 : vector<8x8xf32>
    %cst_20 = arith.constant dense<0.000000e+00> : vector<8xf32>
    %57 = vector.multi_reduction <add>, %56, %cst_20 [1] : vector<8x8xf32> to vector<8xf32>
    %58 = vector.shape_cast %57 : vector<8xf32> to vector<8x1xf32>
    %59 = tpu.reciprocal %58 {approx = true} : vector<8x1xf32> -> vector<8x1xf32>
    %60 = vector.broadcast %59 : vector<8x1xf32> to vector<8x8xf32>
    %61 = arith.mulf %56, %60 : vector<8x8xf32>
    %62 = arith.truncf %61 : vector<8x8xf32> to vector<8x8xbf16>
    %cst_21 = arith.constant dense<0.000000e+00> : vector<8x8xf32>
    %63 = tpu.matmul %62, %48, %cst_21 {dimension_numbers = #tpu.dot_dimension_numbers<[1], [0], [0], [1], [0, 0, 1, 1], [], []>} : vector<8x8xbf16>, vector<8x8xbf16>, vector<8x8xf32> -> vector<8x8xf32>
    %64 = arith.truncf %63 : vector<8x8xf32> to vector<8x8xbf16>
    %65 = vector.extract_strided_slice %3 {offsets = [0, 24], sizes = [8, 8], strides = [1, 1]} : vector<8x32xbf16> to vector<8x8xbf16>
    %66 = vector.extract_strided_slice %5 {offsets = [0, 24], sizes = [8, 8], strides = [1, 1]} : vector<8x32xbf16> to vector<8x8xbf16>
    %67 = vector.extract_strided_slice %7 {offsets = [0, 24], sizes = [8, 8], strides = [1, 1]} : vector<8x32xbf16> to vector<8x8xbf16>
    %cst_22 = arith.constant dense<0.000000e+00> : vector<8x8xf32>
    %68 = tpu.matmul %65, %66, %cst_22 {dimension_numbers = #tpu.dot_dimension_numbers<[1], [1], [0], [0], [0, 0, 1, 0], [], []>} : vector<8x8xbf16>, vector<8x8xbf16>, vector<8x8xf32> -> vector<8x8xf32>
    %69 = vector.broadcast %1 : vector<1x8xf32> to vector<8x8xf32>
    %70 = arith.addf %68, %69 : vector<8x8xf32>
    %cst_23 = arith.constant dense<0xFF800000> : vector<8xf32>
    %71 = vector.multi_reduction <maximumf>, %70, %cst_23 [1] : vector<8x8xf32> to vector<8xf32>
    %72 = vector.shape_cast %71 : vector<8xf32> to vector<8x1xf32>
    %73 = vector.broadcast %72 : vector<8x1xf32> to vector<8x8xf32>
    %74 = arith.subf %70, %73 : vector<8x8xf32>
    %75 = math.exp %74 : vector<8x8xf32>
    %cst_24 = arith.constant dense<0.000000e+00> : vector<8xf32>
    %76 = vector.multi_reduction <add>, %75, %cst_24 [1] : vector<8x8xf32> to vector<8xf32>
    %77 = vector.shape_cast %76 : vector<8xf32> to vector<8x1xf32>
    %78 = tpu.reciprocal %77 {approx = true} : vector<8x1xf32> -> vector<8x1xf32>
    %79 = vector.broadcast %78 : vector<8x1xf32> to vector<8x8xf32>
    %80 = arith.mulf %75, %79 : vector<8x8xf32>
    %81 = arith.truncf %80 : vector<8x8xf32> to vector<8x8xbf16>
    %cst_25 = arith.constant dense<0.000000e+00> : vector<8x8xf32>
    %82 = tpu.matmul %81, %67, %cst_25 {dimension_numbers = #tpu.dot_dimension_numbers<[1], [0], [0], [1], [0, 0, 1, 1], [], []>} : vector<8x8xbf16>, vector<8x8xbf16>, vector<8x8xf32> -> vector<8x8xf32>
    %83 = arith.truncf %82 : vector<8x8xf32> to vector<8x8xbf16>
    %84 = tpu.concatenate %26, %45, %64, %83 in 1 : vector<8x8xbf16>, vector<8x8xbf16>, vector<8x8xbf16>, vector<8x8xbf16> -> vector<8x32xbf16>
    %c0_26 = arith.constant 0 : index
    %c0_27 = arith.constant 0 : index
    %85 = vector.load %arg6[%c0_26, %c0_27] : memref<32x32xbf16, #tpu.memory_space<vmem>>, vector<32x32xbf16>
    %cst_28 = arith.constant dense<0.000000e+00> : vector<8x32xf32>
    %86 = tpu.matmul %84, %85, %cst_28 {dimension_numbers = #tpu.dot_dimension_numbers<[1], [0], [0], [1], [0, 0, 1, 1], [], []>} : vector<8x32xbf16>, vector<32x32xbf16>, vector<8x32xf32> -> vector<8x32xf32>
    %c0_29 = arith.constant 0 : index
    %c0_30 = arith.constant 0 : index
    %87 = vector.load %arg7[%c0_29, %c0_30] : memref<1x32xf32, #tpu.memory_space<vmem>>, vector<1x32xf32>
    %88 = vector.broadcast %87 : vector<1x32xf32> to vector<8x32xf32>
    %89 = arith.addf %86, %88 : vector<8x32xf32>
    %c0_31 = arith.constant 0 : index
    %c0_32 = arith.constant 0 : index
    %c0_33 = arith.constant 0 : index
    %90 = vector.load %arg8[%c0_31, %c0_32, %c0_33] : memref<1x8x32xf32, #tpu.memory_space<vmem>>, vector<1x8x32xf32>
    %91 = vector.shape_cast %90 : vector<1x8x32xf32> to vector<8x32xf32>
    %92 = arith.addf %89, %91 : vector<8x32xf32>
    %c0_34 = arith.constant 0 : index
    %c0_35 = arith.constant 0 : index
    %c0_36 = arith.constant 0 : index
    %93 = vector.load %arg9[%c0_34, %c0_35, %c0_36] : memref<1x8x32xf32, #tpu.memory_space<vmem>>, vector<1x8x32xf32>
    %94 = vector.shape_cast %93 : vector<1x8x32xf32> to vector<8x32xf32>
    %95 = vector.shape_cast %92 : vector<8x32xf32> to vector<1x8x32xf32>
    tpu.vector_store %arg9[%c0_34, %c0_35, %c0_36], %95 {strides = array<i32>} : memref<1x8x32xf32, #tpu.memory_space<vmem>>, vector<1x8x32xf32>,
    return
  }
  func.func @transform_0(%arg0: i32, %arg1: i32) -> (i32, i32, i32) {
    %c0_i32 = arith.constant 0 : i32
    %c0_i32_0 = arith.constant 0 : i32
    return %arg0, %arg1, %c0_i32 : i32, i32, i32
  }
  func.func @transform_1(%arg0: i32, %arg1: i32) -> (i32, i32, i32) {
    %c0_i32 = arith.constant 0 : i32
    %c0_i32_0 = arith.constant 0 : i32
    %c0_i32_1 = arith.constant 0 : i32
    return %arg0, %c0_i32, %c0_i32_0 : i32, i32, i32
  }
  func.func @transform_2(%arg0: i32, %arg1: i32) -> (i32, i32, i32) {
    %c0_i32 = arith.constant 0 : i32
    %c0_i32_0 = arith.constant 0 : i32
    %c0_i32_1 = arith.constant 0 : i32
    return %arg0, %c0_i32, %c0_i32_0 : i32, i32, i32
  }
  func.func @transform_3(%arg0: i32, %arg1: i32) -> (i32, i32, i32) {
    %c0_i32 = arith.constant 0 : i32
    %c0_i32_0 = arith.constant 0 : i32
    %c0_i32_1 = arith.constant 0 : i32
    return %arg0, %c0_i32, %c0_i32_0 : i32, i32, i32
  }
  func.func @transform_4(%arg0: i32, %arg1: i32) -> (i32, i32) {
    %c0_i32 = arith.constant 0 : i32
    %c0_i32_0 = arith.constant 0 : i32
    %c0_i32_1 = arith.constant 0 : i32
    return %c0_i32, %c0_i32_0 : i32, i32
  }
  func.func @transform_5(%arg0: i32, %arg1: i32) -> (i32, i32) {
    %c0_i32 = arith.constant 0 : i32
    %c0_i32_0 = arith.constant 0 : i32
    %c0_i32_1 = arith.constant 0 : i32
    return %c0_i32, %c0_i32_0 : i32, i32
  }
  func.func @transform_6(%arg0: i32, %arg1: i32) -> (i32, i32, i32) {
    %c0_i32 = arith.constant 0 : i32
    %c0_i32_0 = arith.constant 0 : i32
    return %arg0, %arg1, %c0_i32 : i32, i32, i32
  }
  func.func @transform_7(%arg0: i32, %arg1: i32) -> (i32, i32, i32) {
    %c0_i32 = arith.constant 0 : i32
    %c0_i32_0 = arith.constant 0 : i32
    return %arg0, %arg1, %c0_i32 : i32, i32, i32
  }
}

module attributes {stable_mosaic.version = 11 : i64} {
  func.func @_cross_proj_kernel(%arg0: i32, %arg1: memref<1x8x32xf32, #tpu.memory_space<vmem>>, %arg2: memref<1x32xf32, #tpu.memory_space<vmem>>, %arg3: memref<1x32xf32, #tpu.memory_space<vmem>>, %arg4: memref<32x32xbf16, #tpu.memory_space<vmem>>, %arg5: memref<1x32xf32, #tpu.memory_space<vmem>>, %arg6: memref<8x32xf32, #tpu.memory_space<vmem>>, %arg7: memref<8x32xf32, #tpu.memory_space<vmem>>, %arg8: memref<8x32xf32, #tpu.memory_space<vmem>>, %arg9: memref<1x16x32xf32, #tpu.memory_space<vmem>>, %arg10: memref<32x64xbf16, #tpu.memory_space<vmem>>, %arg11: memref<1x64xf32, #tpu.memory_space<vmem>>, %arg12: memref<16x32xf32, #tpu.memory_space<vmem>>, %arg13: memref<16x32xf32, #tpu.memory_space<vmem>>, %arg14: memref<16x32xf32, #tpu.memory_space<vmem>>, %arg15: memref<1x8x32xbf16, #tpu.memory_space<vmem>>, %arg16: memref<1x16x32xbf16, #tpu.memory_space<vmem>>, %arg17: memref<1x16x32xbf16, #tpu.memory_space<vmem>>) attributes {dimension_semantics = [#tpu.dimension_semantics<parallel>], iteration_bounds = array<i64: 2>, scalar_prefetch = 0 : i64, scratch_operands = 0 : i64, tpu.core_type = #tpu.core_type<tc>, window_params = [{transform_indices = @transform_0, window_bounds = array<i64: 1, 8, 32>}, {pipeline_mode = #tpu.pipeline_mode<synchronous>, transform_indices = @transform_1, window_bounds = array<i64: 1, 32>}, {pipeline_mode = #tpu.pipeline_mode<synchronous>, transform_indices = @transform_2, window_bounds = array<i64: 1, 32>}, {pipeline_mode = #tpu.pipeline_mode<synchronous>, transform_indices = @transform_3, window_bounds = array<i64: 32, 32>}, {pipeline_mode = #tpu.pipeline_mode<synchronous>, transform_indices = @transform_4, window_bounds = array<i64: 1, 32>}, {pipeline_mode = #tpu.pipeline_mode<synchronous>, transform_indices = @transform_5, window_bounds = array<i64: 8, 32>}, {pipeline_mode = #tpu.pipeline_mode<synchronous>, transform_indices = @transform_6, window_bounds = array<i64: 8, 32>}, {pipeline_mode = #tpu.pipeline_mode<synchronous>, transform_indices = @transform_7, window_bounds = array<i64: 8, 32>}, {transform_indices = @transform_8, window_bounds = array<i64: 1, 16, 32>}, {pipeline_mode = #tpu.pipeline_mode<synchronous>, transform_indices = @transform_9, window_bounds = array<i64: 32, 64>}, {pipeline_mode = #tpu.pipeline_mode<synchronous>, transform_indices = @transform_10, window_bounds = array<i64: 1, 64>}, {pipeline_mode = #tpu.pipeline_mode<synchronous>, transform_indices = @transform_11, window_bounds = array<i64: 16, 32>}, {pipeline_mode = #tpu.pipeline_mode<synchronous>, transform_indices = @transform_12, window_bounds = array<i64: 16, 32>}, {pipeline_mode = #tpu.pipeline_mode<synchronous>, transform_indices = @transform_13, window_bounds = array<i64: 16, 32>}, {transform_indices = @transform_14, window_bounds = array<i64: 1, 8, 32>}, {transform_indices = @transform_15, window_bounds = array<i64: 1, 16, 32>}, {transform_indices = @transform_16, window_bounds = array<i64: 1, 16, 32>}]} {
    %c0 = arith.constant 0 : index
    %c0_0 = arith.constant 0 : index
    %c0_1 = arith.constant 0 : index
    %0 = vector.load %arg1[%c0, %c0_0, %c0_1] : memref<1x8x32xf32, #tpu.memory_space<vmem>>, vector<1x8x32xf32>
    %1 = vector.shape_cast %0 : vector<1x8x32xf32> to vector<8x32xf32>
    %cst = arith.constant dense<0.000000e+00> : vector<8xf32>
    %2 = vector.multi_reduction <add>, %1, %cst [1] : vector<8x32xf32> to vector<8xf32>
    %3 = vector.shape_cast %2 : vector<8xf32> to vector<8x1xf32>
    %cst_2 = arith.constant 3.200000e+01 : f32
    %4 = vector.broadcast %cst_2 : f32 to vector<8x1xf32>
    %5 = arith.divf %3, %4 : vector<8x1xf32>
    %6 = vector.broadcast %5 : vector<8x1xf32> to vector<8x32xf32>
    %7 = arith.subf %1, %6 : vector<8x32xf32>
    %8 = arith.mulf %7, %7 : vector<8x32xf32>
    %cst_3 = arith.constant dense<0.000000e+00> : vector<8xf32>
    %9 = vector.multi_reduction <add>, %8, %cst_3 [1] : vector<8x32xf32> to vector<8xf32>
    %10 = vector.shape_cast %9 : vector<8xf32> to vector<8x1xf32>
    %cst_4 = arith.constant 3.200000e+01 : f32
    %11 = vector.broadcast %cst_4 : f32 to vector<8x1xf32>
    %12 = arith.divf %10, %11 : vector<8x1xf32>
    %cst_5 = arith.constant 9.99999974E-6 : f32
    %13 = vector.broadcast %cst_5 : f32 to vector<8x1xf32>
    %14 = arith.addf %12, %13 : vector<8x1xf32>
    %15 = math.rsqrt %14 : vector<8x1xf32>
    %16 = vector.broadcast %15 : vector<8x1xf32> to vector<8x32xf32>
    %17 = arith.mulf %7, %16 : vector<8x32xf32>
    %c0_6 = arith.constant 0 : index
    %c0_7 = arith.constant 0 : index
    %18 = vector.load %arg2[%c0_6, %c0_7] : memref<1x32xf32, #tpu.memory_space<vmem>>, vector<1x32xf32>
    %19 = vector.broadcast %18 : vector<1x32xf32> to vector<8x32xf32>
    %20 = arith.mulf %17, %19 : vector<8x32xf32>
    %c0_8 = arith.constant 0 : index
    %c0_9 = arith.constant 0 : index
    %21 = vector.load %arg3[%c0_8, %c0_9] : memref<1x32xf32, #tpu.memory_space<vmem>>, vector<1x32xf32>
    %22 = vector.broadcast %21 : vector<1x32xf32> to vector<8x32xf32>
    %23 = arith.addf %20, %22 : vector<8x32xf32>
    %24 = arith.truncf %23 : vector<8x32xf32> to vector<8x32xbf16>
    %c0_10 = arith.constant 0 : index
    %c0_11 = arith.constant 0 : index
    %25 = vector.load %arg4[%c0_10, %c0_11] : memref<32x32xbf16, #tpu.memory_space<vmem>>, vector<32x32xbf16>
    %cst_12 = arith.constant dense<0.000000e+00> : vector<8x32xf32>
    %26 = tpu.matmul %24, %25, %cst_12 {dimension_numbers = #tpu.dot_dimension_numbers<[1], [0], [0], [1], [0, 0, 1, 1], [], []>} : vector<8x32xbf16>, vector<32x32xbf16>, vector<8x32xf32> -> vector<8x32xf32>
    %c0_13 = arith.constant 0 : index
    %c0_14 = arith.constant 0 : index
    %27 = vector.load %arg5[%c0_13, %c0_14] : memref<1x32xf32, #tpu.memory_space<vmem>>, vector<1x32xf32>
    %28 = vector.broadcast %27 : vector<1x32xf32> to vector<8x32xf32>
    %29 = arith.addf %26, %28 : vector<8x32xf32>
    %c0_15 = arith.constant 0 : index
    %c0_16 = arith.constant 0 : index
    %30 = vector.load %arg6[%c0_15, %c0_16] : memref<8x32xf32, #tpu.memory_space<vmem>>, vector<8x32xf32>
    %31 = arith.mulf %29, %30 : vector<8x32xf32>
    %c31_i32 = arith.constant 31 : i32
    %32 = tpu.dynamic_rotate %29 by %c31_i32 dim 1 : vector<8x32xf32>, i32 -> vector<8x32xf32>
    %c0_17 = arith.constant 0 : index
    %c0_18 = arith.constant 0 : index
    %33 = vector.load %arg7[%c0_17, %c0_18] : memref<8x32xf32, #tpu.memory_space<vmem>>, vector<8x32xf32>
    %34 = arith.mulf %32, %33 : vector<8x32xf32>
    %35 = arith.addf %31, %34 : vector<8x32xf32>
    %c1_i32 = arith.constant 1 : i32
    %36 = tpu.dynamic_rotate %29 by %c1_i32 dim 1 : vector<8x32xf32>, i32 -> vector<8x32xf32>
    %c0_19 = arith.constant 0 : index
    %c0_20 = arith.constant 0 : index
    %37 = vector.load %arg8[%c0_19, %c0_20] : memref<8x32xf32, #tpu.memory_space<vmem>>, vector<8x32xf32>
    %38 = arith.mulf %36, %37 : vector<8x32xf32>
    %39 = arith.addf %35, %38 : vector<8x32xf32>
    %40 = arith.truncf %39 : vector<8x32xf32> to vector<8x32xbf16>
    %c0_21 = arith.constant 0 : index
    %c0_22 = arith.constant 0 : index
    %c0_23 = arith.constant 0 : index
    %41 = vector.load %arg15[%c0_21, %c0_22, %c0_23] : memref<1x8x32xbf16, #tpu.memory_space<vmem>>, vector<1x8x32xbf16>
    %42 = vector.shape_cast %41 : vector<1x8x32xbf16> to vector<8x32xbf16>
    %43 = vector.shape_cast %40 : vector<8x32xbf16> to vector<1x8x32xbf16>
    tpu.vector_store %arg15[%c0_21, %c0_22, %c0_23], %43 {strides = array<i32>} : memref<1x8x32xbf16, #tpu.memory_space<vmem>>, vector<1x8x32xbf16>,
    %c0_24 = arith.constant 0 : index
    %c0_25 = arith.constant 0 : index
    %c0_26 = arith.constant 0 : index
    %44 = vector.load %arg9[%c0_24, %c0_25, %c0_26] : memref<1x16x32xf32, #tpu.memory_space<vmem>>, vector<1x16x32xf32>
    %45 = vector.shape_cast %44 : vector<1x16x32xf32> to vector<16x32xf32>
    %46 = arith.truncf %45 : vector<16x32xf32> to vector<16x32xbf16>
    %c0_27 = arith.constant 0 : index
    %c0_28 = arith.constant 0 : index
    %47 = vector.load %arg10[%c0_27, %c0_28] : memref<32x64xbf16, #tpu.memory_space<vmem>>, vector<32x64xbf16>
    %cst_29 = arith.constant dense<0.000000e+00> : vector<16x64xf32>
    %48 = tpu.matmul %46, %47, %cst_29 {dimension_numbers = #tpu.dot_dimension_numbers<[1], [0], [0], [1], [0, 0, 1, 1], [], []>} : vector<16x32xbf16>, vector<32x64xbf16>, vector<16x64xf32> -> vector<16x64xf32>
    %c0_30 = arith.constant 0 : index
    %c0_31 = arith.constant 0 : index
    %49 = vector.load %arg11[%c0_30, %c0_31] : memref<1x64xf32, #tpu.memory_space<vmem>>, vector<1x64xf32>
    %50 = vector.broadcast %49 : vector<1x64xf32> to vector<16x64xf32>
    %51 = arith.addf %48, %50 : vector<16x64xf32>
    %52 = vector.extract_strided_slice %51 {offsets = [0, 0], sizes = [16, 32], strides = [1, 1]} : vector<16x64xf32> to vector<16x32xf32>
    %c0_32 = arith.constant 0 : index
    %c0_33 = arith.constant 0 : index
    %53 = vector.load %arg12[%c0_32, %c0_33] : memref<16x32xf32, #tpu.memory_space<vmem>>, vector<16x32xf32>
    %54 = arith.mulf %52, %53 : vector<16x32xf32>
    %c31_i32_34 = arith.constant 31 : i32
    %55 = tpu.dynamic_rotate %52 by %c31_i32_34 dim 1 : vector<16x32xf32>, i32 -> vector<16x32xf32>
    %c0_35 = arith.constant 0 : index
    %c0_36 = arith.constant 0 : index
    %56 = vector.load %arg13[%c0_35, %c0_36] : memref<16x32xf32, #tpu.memory_space<vmem>>, vector<16x32xf32>
    %57 = arith.mulf %55, %56 : vector<16x32xf32>
    %58 = arith.addf %54, %57 : vector<16x32xf32>
    %c1_i32_37 = arith.constant 1 : i32
    %59 = tpu.dynamic_rotate %52 by %c1_i32_37 dim 1 : vector<16x32xf32>, i32 -> vector<16x32xf32>
    %c0_38 = arith.constant 0 : index
    %c0_39 = arith.constant 0 : index
    %60 = vector.load %arg14[%c0_38, %c0_39] : memref<16x32xf32, #tpu.memory_space<vmem>>, vector<16x32xf32>
    %61 = arith.mulf %59, %60 : vector<16x32xf32>
    %62 = arith.addf %58, %61 : vector<16x32xf32>
    %63 = arith.truncf %62 : vector<16x32xf32> to vector<16x32xbf16>
    %c0_40 = arith.constant 0 : index
    %c0_41 = arith.constant 0 : index
    %c0_42 = arith.constant 0 : index
    %64 = vector.load %arg16[%c0_40, %c0_41, %c0_42] : memref<1x16x32xbf16, #tpu.memory_space<vmem>>, vector<1x16x32xbf16>
    %65 = vector.shape_cast %64 : vector<1x16x32xbf16> to vector<16x32xbf16>
    %66 = vector.shape_cast %63 : vector<16x32xbf16> to vector<1x16x32xbf16>
    tpu.vector_store %arg16[%c0_40, %c0_41, %c0_42], %66 {strides = array<i32>} : memref<1x16x32xbf16, #tpu.memory_space<vmem>>, vector<1x16x32xbf16>,
    %67 = vector.extract_strided_slice %51 {offsets = [0, 32], sizes = [16, 32], strides = [1, 1]} : vector<16x64xf32> to vector<16x32xf32>
    %68 = arith.truncf %67 : vector<16x32xf32> to vector<16x32xbf16>
    %c0_43 = arith.constant 0 : index
    %c0_44 = arith.constant 0 : index
    %c0_45 = arith.constant 0 : index
    %69 = vector.load %arg17[%c0_43, %c0_44, %c0_45] : memref<1x16x32xbf16, #tpu.memory_space<vmem>>, vector<1x16x32xbf16>
    %70 = vector.shape_cast %69 : vector<1x16x32xbf16> to vector<16x32xbf16>
    %71 = vector.shape_cast %68 : vector<16x32xbf16> to vector<1x16x32xbf16>
    tpu.vector_store %arg17[%c0_43, %c0_44, %c0_45], %71 {strides = array<i32>} : memref<1x16x32xbf16, #tpu.memory_space<vmem>>, vector<1x16x32xbf16>,
    return
  }
  func.func @transform_0(%arg0: i32) -> (i32, i32, i32) {
    %c0_i32 = arith.constant 0 : i32
    %c0_i32_0 = arith.constant 0 : i32
    %c0_i32_1 = arith.constant 0 : i32
    return %arg0, %c0_i32, %c0_i32_0 : i32, i32, i32
  }
  func.func @transform_1(%arg0: i32) -> (i32, i32) {
    %c0_i32 = arith.constant 0 : i32
    %c0_i32_0 = arith.constant 0 : i32
    %c0_i32_1 = arith.constant 0 : i32
    return %c0_i32, %c0_i32_0 : i32, i32
  }
  func.func @transform_2(%arg0: i32) -> (i32, i32) {
    %c0_i32 = arith.constant 0 : i32
    %c0_i32_0 = arith.constant 0 : i32
    %c0_i32_1 = arith.constant 0 : i32
    return %c0_i32, %c0_i32_0 : i32, i32
  }
  func.func @transform_3(%arg0: i32) -> (i32, i32) {
    %c0_i32 = arith.constant 0 : i32
    %c0_i32_0 = arith.constant 0 : i32
    %c0_i32_1 = arith.constant 0 : i32
    return %c0_i32, %c0_i32_0 : i32, i32
  }
  func.func @transform_4(%arg0: i32) -> (i32, i32) {
    %c0_i32 = arith.constant 0 : i32
    %c0_i32_0 = arith.constant 0 : i32
    %c0_i32_1 = arith.constant 0 : i32
    return %c0_i32, %c0_i32_0 : i32, i32
  }
  func.func @transform_5(%arg0: i32) -> (i32, i32) {
    %c0_i32 = arith.constant 0 : i32
    %c0_i32_0 = arith.constant 0 : i32
    %c0_i32_1 = arith.constant 0 : i32
    return %c0_i32, %c0_i32_0 : i32, i32
  }
  func.func @transform_6(%arg0: i32) -> (i32, i32) {
    %c0_i32 = arith.constant 0 : i32
    %c0_i32_0 = arith.constant 0 : i32
    %c0_i32_1 = arith.constant 0 : i32
    return %c0_i32, %c0_i32_0 : i32, i32
  }
  func.func @transform_7(%arg0: i32) -> (i32, i32) {
    %c0_i32 = arith.constant 0 : i32
    %c0_i32_0 = arith.constant 0 : i32
    %c0_i32_1 = arith.constant 0 : i32
    return %c0_i32, %c0_i32_0 : i32, i32
  }
  func.func @transform_8(%arg0: i32) -> (i32, i32, i32) {
    %c0_i32 = arith.constant 0 : i32
    %c0_i32_0 = arith.constant 0 : i32
    %c0_i32_1 = arith.constant 0 : i32
    return %arg0, %c0_i32, %c0_i32_0 : i32, i32, i32
  }
  func.func @transform_9(%arg0: i32) -> (i32, i32) {
    %c0_i32 = arith.constant 0 : i32
    %c0_i32_0 = arith.constant 0 : i32
    %c0_i32_1 = arith.constant 0 : i32
    return %c0_i32, %c0_i32_0 : i32, i32
  }
  func.func @transform_10(%arg0: i32) -> (i32, i32) {
    %c0_i32 = arith.constant 0 : i32
    %c0_i32_0 = arith.constant 0 : i32
    %c0_i32_1 = arith.constant 0 : i32
    return %c0_i32, %c0_i32_0 : i32, i32
  }
  func.func @transform_11(%arg0: i32) -> (i32, i32) {
    %c0_i32 = arith.constant 0 : i32
    %c0_i32_0 = arith.constant 0 : i32
    %c0_i32_1 = arith.constant 0 : i32
    return %c0_i32, %c0_i32_0 : i32, i32
  }
  func.func @transform_12(%arg0: i32) -> (i32, i32) {
    %c0_i32 = arith.constant 0 : i32
    %c0_i32_0 = arith.constant 0 : i32
    %c0_i32_1 = arith.constant 0 : i32
    return %c0_i32, %c0_i32_0 : i32, i32
  }
  func.func @transform_13(%arg0: i32) -> (i32, i32) {
    %c0_i32 = arith.constant 0 : i32
    %c0_i32_0 = arith.constant 0 : i32
    %c0_i32_1 = arith.constant 0 : i32
    return %c0_i32, %c0_i32_0 : i32, i32
  }
  func.func @transform_14(%arg0: i32) -> (i32, i32, i32) {
    %c0_i32 = arith.constant 0 : i32
    %c0_i32_0 = arith.constant 0 : i32
    %c0_i32_1 = arith.constant 0 : i32
    return %arg0, %c0_i32, %c0_i32_0 : i32, i32, i32
  }
  func.func @transform_15(%arg0: i32) -> (i32, i32, i32) {
    %c0_i32 = arith.constant 0 : i32
    %c0_i32_0 = arith.constant 0 : i32
    %c0_i32_1 = arith.constant 0 : i32
    return %arg0, %c0_i32, %c0_i32_0 : i32, i32, i32
  }
  func.func @transform_16(%arg0: i32) -> (i32, i32, i32) {
    %c0_i32 = arith.constant 0 : i32
    %c0_i32_0 = arith.constant 0 : i32
    %c0_i32_1 = arith.constant 0 : i32
    return %arg0, %c0_i32, %c0_i32_0 : i32, i32, i32
  }
}

module attributes {stable_mosaic.version = 11 : i64} {
  func.func @_attn_kernel(%arg0: i32, %arg1: i32, %arg2: memref<1x8x32xbf16, #tpu.memory_space<vmem>>, %arg3: memref<1x16x32xbf16, #tpu.memory_space<vmem>>, %arg4: memref<1x16x32xbf16, #tpu.memory_space<vmem>>, %arg5: memref<1x1x16xf32, #tpu.memory_space<vmem>>, %arg6: memref<32x32xbf16, #tpu.memory_space<vmem>>, %arg7: memref<1x32xf32, #tpu.memory_space<vmem>>, %arg8: memref<1x8x32xf32, #tpu.memory_space<vmem>>, %arg9: memref<1x8x32xf32, #tpu.memory_space<vmem>>) attributes {dimension_semantics = [#tpu.dimension_semantics<parallel>, #tpu.dimension_semantics<parallel>], iteration_bounds = array<i64: 2, 1>, scalar_prefetch = 0 : i64, scratch_operands = 0 : i64, tpu.core_type = #tpu.core_type<tc>, window_params = [{transform_indices = @transform_0, window_bounds = array<i64: 1, 8, 32>}, {transform_indices = @transform_1, window_bounds = array<i64: 1, 16, 32>}, {transform_indices = @transform_2, window_bounds = array<i64: 1, 16, 32>}, {transform_indices = @transform_3, window_bounds = array<i64: 1, 1, 16>}, {pipeline_mode = #tpu.pipeline_mode<synchronous>, transform_indices = @transform_4, window_bounds = array<i64: 32, 32>}, {pipeline_mode = #tpu.pipeline_mode<synchronous>, transform_indices = @transform_5, window_bounds = array<i64: 1, 32>}, {transform_indices = @transform_6, window_bounds = array<i64: 1, 8, 32>}, {transform_indices = @transform_7, window_bounds = array<i64: 1, 8, 32>}]} {
    %c0 = arith.constant 0 : index
    %c0_0 = arith.constant 0 : index
    %c0_1 = arith.constant 0 : index
    %0 = vector.load %arg5[%c0, %c0_0, %c0_1] : memref<1x1x16xf32, #tpu.memory_space<vmem>>, vector<1x1x16xf32>
    %1 = vector.shape_cast %0 : vector<1x1x16xf32> to vector<1x16xf32>
    %c0_2 = arith.constant 0 : index
    %c0_3 = arith.constant 0 : index
    %c0_4 = arith.constant 0 : index
    %2 = vector.load %arg2[%c0_2, %c0_3, %c0_4] : memref<1x8x32xbf16, #tpu.memory_space<vmem>>, vector<1x8x32xbf16>
    %3 = vector.shape_cast %2 : vector<1x8x32xbf16> to vector<8x32xbf16>
    %c0_5 = arith.constant 0 : index
    %c0_6 = arith.constant 0 : index
    %c0_7 = arith.constant 0 : index
    %4 = vector.load %arg3[%c0_5, %c0_6, %c0_7] : memref<1x16x32xbf16, #tpu.memory_space<vmem>>, vector<1x16x32xbf16>
    %5 = vector.shape_cast %4 : vector<1x16x32xbf16> to vector<16x32xbf16>
    %c0_8 = arith.constant 0 : index
    %c0_9 = arith.constant 0 : index
    %c0_10 = arith.constant 0 : index
    %6 = vector.load %arg4[%c0_8, %c0_9, %c0_10] : memref<1x16x32xbf16, #tpu.memory_space<vmem>>, vector<1x16x32xbf16>
    %7 = vector.shape_cast %6 : vector<1x16x32xbf16> to vector<16x32xbf16>
    %8 = vector.extract_strided_slice %3 {offsets = [0, 0], sizes = [8, 8], strides = [1, 1]} : vector<8x32xbf16> to vector<8x8xbf16>
    %9 = vector.extract_strided_slice %5 {offsets = [0, 0], sizes = [16, 8], strides = [1, 1]} : vector<16x32xbf16> to vector<16x8xbf16>
    %10 = vector.extract_strided_slice %7 {offsets = [0, 0], sizes = [16, 8], strides = [1, 1]} : vector<16x32xbf16> to vector<16x8xbf16>
    %cst = arith.constant dense<0.000000e+00> : vector<8x16xf32>
    %11 = tpu.matmul %8, %9, %cst {dimension_numbers = #tpu.dot_dimension_numbers<[1], [1], [0], [0], [0, 0, 1, 0], [], []>} : vector<8x8xbf16>, vector<16x8xbf16>, vector<8x16xf32> -> vector<8x16xf32>
    %12 = vector.broadcast %1 : vector<1x16xf32> to vector<8x16xf32>
    %13 = arith.addf %11, %12 : vector<8x16xf32>
    %cst_11 = arith.constant dense<0xFF800000> : vector<8xf32>
    %14 = vector.multi_reduction <maximumf>, %13, %cst_11 [1] : vector<8x16xf32> to vector<8xf32>
    %15 = vector.shape_cast %14 : vector<8xf32> to vector<8x1xf32>
    %16 = vector.broadcast %15 : vector<8x1xf32> to vector<8x16xf32>
    %17 = arith.subf %13, %16 : vector<8x16xf32>
    %18 = math.exp %17 : vector<8x16xf32>
    %cst_12 = arith.constant dense<0.000000e+00> : vector<8xf32>
    %19 = vector.multi_reduction <add>, %18, %cst_12 [1] : vector<8x16xf32> to vector<8xf32>
    %20 = vector.shape_cast %19 : vector<8xf32> to vector<8x1xf32>
    %21 = tpu.reciprocal %20 {approx = true} : vector<8x1xf32> -> vector<8x1xf32>
    %22 = vector.broadcast %21 : vector<8x1xf32> to vector<8x16xf32>
    %23 = arith.mulf %18, %22 : vector<8x16xf32>
    %24 = arith.truncf %23 : vector<8x16xf32> to vector<8x16xbf16>
    %cst_13 = arith.constant dense<0.000000e+00> : vector<8x8xf32>
    %25 = tpu.matmul %24, %10, %cst_13 {dimension_numbers = #tpu.dot_dimension_numbers<[1], [0], [0], [1], [0, 0, 1, 1], [], []>} : vector<8x16xbf16>, vector<16x8xbf16>, vector<8x8xf32> -> vector<8x8xf32>
    %26 = arith.truncf %25 : vector<8x8xf32> to vector<8x8xbf16>
    %27 = vector.extract_strided_slice %3 {offsets = [0, 8], sizes = [8, 8], strides = [1, 1]} : vector<8x32xbf16> to vector<8x8xbf16>
    %28 = vector.extract_strided_slice %5 {offsets = [0, 8], sizes = [16, 8], strides = [1, 1]} : vector<16x32xbf16> to vector<16x8xbf16>
    %29 = vector.extract_strided_slice %7 {offsets = [0, 8], sizes = [16, 8], strides = [1, 1]} : vector<16x32xbf16> to vector<16x8xbf16>
    %cst_14 = arith.constant dense<0.000000e+00> : vector<8x16xf32>
    %30 = tpu.matmul %27, %28, %cst_14 {dimension_numbers = #tpu.dot_dimension_numbers<[1], [1], [0], [0], [0, 0, 1, 0], [], []>} : vector<8x8xbf16>, vector<16x8xbf16>, vector<8x16xf32> -> vector<8x16xf32>
    %31 = vector.broadcast %1 : vector<1x16xf32> to vector<8x16xf32>
    %32 = arith.addf %30, %31 : vector<8x16xf32>
    %cst_15 = arith.constant dense<0xFF800000> : vector<8xf32>
    %33 = vector.multi_reduction <maximumf>, %32, %cst_15 [1] : vector<8x16xf32> to vector<8xf32>
    %34 = vector.shape_cast %33 : vector<8xf32> to vector<8x1xf32>
    %35 = vector.broadcast %34 : vector<8x1xf32> to vector<8x16xf32>
    %36 = arith.subf %32, %35 : vector<8x16xf32>
    %37 = math.exp %36 : vector<8x16xf32>
    %cst_16 = arith.constant dense<0.000000e+00> : vector<8xf32>
    %38 = vector.multi_reduction <add>, %37, %cst_16 [1] : vector<8x16xf32> to vector<8xf32>
    %39 = vector.shape_cast %38 : vector<8xf32> to vector<8x1xf32>
    %40 = tpu.reciprocal %39 {approx = true} : vector<8x1xf32> -> vector<8x1xf32>
    %41 = vector.broadcast %40 : vector<8x1xf32> to vector<8x16xf32>
    %42 = arith.mulf %37, %41 : vector<8x16xf32>
    %43 = arith.truncf %42 : vector<8x16xf32> to vector<8x16xbf16>
    %cst_17 = arith.constant dense<0.000000e+00> : vector<8x8xf32>
    %44 = tpu.matmul %43, %29, %cst_17 {dimension_numbers = #tpu.dot_dimension_numbers<[1], [0], [0], [1], [0, 0, 1, 1], [], []>} : vector<8x16xbf16>, vector<16x8xbf16>, vector<8x8xf32> -> vector<8x8xf32>
    %45 = arith.truncf %44 : vector<8x8xf32> to vector<8x8xbf16>
    %46 = vector.extract_strided_slice %3 {offsets = [0, 16], sizes = [8, 8], strides = [1, 1]} : vector<8x32xbf16> to vector<8x8xbf16>
    %47 = vector.extract_strided_slice %5 {offsets = [0, 16], sizes = [16, 8], strides = [1, 1]} : vector<16x32xbf16> to vector<16x8xbf16>
    %48 = vector.extract_strided_slice %7 {offsets = [0, 16], sizes = [16, 8], strides = [1, 1]} : vector<16x32xbf16> to vector<16x8xbf16>
    %cst_18 = arith.constant dense<0.000000e+00> : vector<8x16xf32>
    %49 = tpu.matmul %46, %47, %cst_18 {dimension_numbers = #tpu.dot_dimension_numbers<[1], [1], [0], [0], [0, 0, 1, 0], [], []>} : vector<8x8xbf16>, vector<16x8xbf16>, vector<8x16xf32> -> vector<8x16xf32>
    %50 = vector.broadcast %1 : vector<1x16xf32> to vector<8x16xf32>
    %51 = arith.addf %49, %50 : vector<8x16xf32>
    %cst_19 = arith.constant dense<0xFF800000> : vector<8xf32>
    %52 = vector.multi_reduction <maximumf>, %51, %cst_19 [1] : vector<8x16xf32> to vector<8xf32>
    %53 = vector.shape_cast %52 : vector<8xf32> to vector<8x1xf32>
    %54 = vector.broadcast %53 : vector<8x1xf32> to vector<8x16xf32>
    %55 = arith.subf %51, %54 : vector<8x16xf32>
    %56 = math.exp %55 : vector<8x16xf32>
    %cst_20 = arith.constant dense<0.000000e+00> : vector<8xf32>
    %57 = vector.multi_reduction <add>, %56, %cst_20 [1] : vector<8x16xf32> to vector<8xf32>
    %58 = vector.shape_cast %57 : vector<8xf32> to vector<8x1xf32>
    %59 = tpu.reciprocal %58 {approx = true} : vector<8x1xf32> -> vector<8x1xf32>
    %60 = vector.broadcast %59 : vector<8x1xf32> to vector<8x16xf32>
    %61 = arith.mulf %56, %60 : vector<8x16xf32>
    %62 = arith.truncf %61 : vector<8x16xf32> to vector<8x16xbf16>
    %cst_21 = arith.constant dense<0.000000e+00> : vector<8x8xf32>
    %63 = tpu.matmul %62, %48, %cst_21 {dimension_numbers = #tpu.dot_dimension_numbers<[1], [0], [0], [1], [0, 0, 1, 1], [], []>} : vector<8x16xbf16>, vector<16x8xbf16>, vector<8x8xf32> -> vector<8x8xf32>
    %64 = arith.truncf %63 : vector<8x8xf32> to vector<8x8xbf16>
    %65 = vector.extract_strided_slice %3 {offsets = [0, 24], sizes = [8, 8], strides = [1, 1]} : vector<8x32xbf16> to vector<8x8xbf16>
    %66 = vector.extract_strided_slice %5 {offsets = [0, 24], sizes = [16, 8], strides = [1, 1]} : vector<16x32xbf16> to vector<16x8xbf16>
    %67 = vector.extract_strided_slice %7 {offsets = [0, 24], sizes = [16, 8], strides = [1, 1]} : vector<16x32xbf16> to vector<16x8xbf16>
    %cst_22 = arith.constant dense<0.000000e+00> : vector<8x16xf32>
    %68 = tpu.matmul %65, %66, %cst_22 {dimension_numbers = #tpu.dot_dimension_numbers<[1], [1], [0], [0], [0, 0, 1, 0], [], []>} : vector<8x8xbf16>, vector<16x8xbf16>, vector<8x16xf32> -> vector<8x16xf32>
    %69 = vector.broadcast %1 : vector<1x16xf32> to vector<8x16xf32>
    %70 = arith.addf %68, %69 : vector<8x16xf32>
    %cst_23 = arith.constant dense<0xFF800000> : vector<8xf32>
    %71 = vector.multi_reduction <maximumf>, %70, %cst_23 [1] : vector<8x16xf32> to vector<8xf32>
    %72 = vector.shape_cast %71 : vector<8xf32> to vector<8x1xf32>
    %73 = vector.broadcast %72 : vector<8x1xf32> to vector<8x16xf32>
    %74 = arith.subf %70, %73 : vector<8x16xf32>
    %75 = math.exp %74 : vector<8x16xf32>
    %cst_24 = arith.constant dense<0.000000e+00> : vector<8xf32>
    %76 = vector.multi_reduction <add>, %75, %cst_24 [1] : vector<8x16xf32> to vector<8xf32>
    %77 = vector.shape_cast %76 : vector<8xf32> to vector<8x1xf32>
    %78 = tpu.reciprocal %77 {approx = true} : vector<8x1xf32> -> vector<8x1xf32>
    %79 = vector.broadcast %78 : vector<8x1xf32> to vector<8x16xf32>
    %80 = arith.mulf %75, %79 : vector<8x16xf32>
    %81 = arith.truncf %80 : vector<8x16xf32> to vector<8x16xbf16>
    %cst_25 = arith.constant dense<0.000000e+00> : vector<8x8xf32>
    %82 = tpu.matmul %81, %67, %cst_25 {dimension_numbers = #tpu.dot_dimension_numbers<[1], [0], [0], [1], [0, 0, 1, 1], [], []>} : vector<8x16xbf16>, vector<16x8xbf16>, vector<8x8xf32> -> vector<8x8xf32>
    %83 = arith.truncf %82 : vector<8x8xf32> to vector<8x8xbf16>
    %84 = tpu.concatenate %26, %45, %64, %83 in 1 : vector<8x8xbf16>, vector<8x8xbf16>, vector<8x8xbf16>, vector<8x8xbf16> -> vector<8x32xbf16>
    %c0_26 = arith.constant 0 : index
    %c0_27 = arith.constant 0 : index
    %85 = vector.load %arg6[%c0_26, %c0_27] : memref<32x32xbf16, #tpu.memory_space<vmem>>, vector<32x32xbf16>
    %cst_28 = arith.constant dense<0.000000e+00> : vector<8x32xf32>
    %86 = tpu.matmul %84, %85, %cst_28 {dimension_numbers = #tpu.dot_dimension_numbers<[1], [0], [0], [1], [0, 0, 1, 1], [], []>} : vector<8x32xbf16>, vector<32x32xbf16>, vector<8x32xf32> -> vector<8x32xf32>
    %c0_29 = arith.constant 0 : index
    %c0_30 = arith.constant 0 : index
    %87 = vector.load %arg7[%c0_29, %c0_30] : memref<1x32xf32, #tpu.memory_space<vmem>>, vector<1x32xf32>
    %88 = vector.broadcast %87 : vector<1x32xf32> to vector<8x32xf32>
    %89 = arith.addf %86, %88 : vector<8x32xf32>
    %c0_31 = arith.constant 0 : index
    %c0_32 = arith.constant 0 : index
    %c0_33 = arith.constant 0 : index
    %90 = vector.load %arg8[%c0_31, %c0_32, %c0_33] : memref<1x8x32xf32, #tpu.memory_space<vmem>>, vector<1x8x32xf32>
    %91 = vector.shape_cast %90 : vector<1x8x32xf32> to vector<8x32xf32>
    %92 = arith.addf %89, %91 : vector<8x32xf32>
    %c0_34 = arith.constant 0 : index
    %c0_35 = arith.constant 0 : index
    %c0_36 = arith.constant 0 : index
    %93 = vector.load %arg9[%c0_34, %c0_35, %c0_36] : memref<1x8x32xf32, #tpu.memory_space<vmem>>, vector<1x8x32xf32>
    %94 = vector.shape_cast %93 : vector<1x8x32xf32> to vector<8x32xf32>
    %95 = vector.shape_cast %92 : vector<8x32xf32> to vector<1x8x32xf32>
    tpu.vector_store %arg9[%c0_34, %c0_35, %c0_36], %95 {strides = array<i32>} : memref<1x8x32xf32, #tpu.memory_space<vmem>>, vector<1x8x32xf32>,
    return
  }
  func.func @transform_0(%arg0: i32, %arg1: i32) -> (i32, i32, i32) {
    %c0_i32 = arith.constant 0 : i32
    %c0_i32_0 = arith.constant 0 : i32
    return %arg0, %arg1, %c0_i32 : i32, i32, i32
  }
  func.func @transform_1(%arg0: i32, %arg1: i32) -> (i32, i32, i32) {
    %c0_i32 = arith.constant 0 : i32
    %c0_i32_0 = arith.constant 0 : i32
    %c0_i32_1 = arith.constant 0 : i32
    return %arg0, %c0_i32, %c0_i32_0 : i32, i32, i32
  }
  func.func @transform_2(%arg0: i32, %arg1: i32) -> (i32, i32, i32) {
    %c0_i32 = arith.constant 0 : i32
    %c0_i32_0 = arith.constant 0 : i32
    %c0_i32_1 = arith.constant 0 : i32
    return %arg0, %c0_i32, %c0_i32_0 : i32, i32, i32
  }
  func.func @transform_3(%arg0: i32, %arg1: i32) -> (i32, i32, i32) {
    %c0_i32 = arith.constant 0 : i32
    %c0_i32_0 = arith.constant 0 : i32
    %c0_i32_1 = arith.constant 0 : i32
    return %arg0, %c0_i32, %c0_i32_0 : i32, i32, i32
  }
  func.func @transform_4(%arg0: i32, %arg1: i32) -> (i32, i32) {
    %c0_i32 = arith.constant 0 : i32
    %c0_i32_0 = arith.constant 0 : i32
    %c0_i32_1 = arith.constant 0 : i32
    return %c0_i32, %c0_i32_0 : i32, i32
  }
  func.func @transform_5(%arg0: i32, %arg1: i32) -> (i32, i32) {
    %c0_i32 = arith.constant 0 : i32
    %c0_i32_0 = arith.constant 0 : i32
    %c0_i32_1 = arith.constant 0 : i32
    return %c0_i32, %c0_i32_0 : i32, i32
  }
  func.func @transform_6(%arg0: i32, %arg1: i32) -> (i32, i32, i32) {
    %c0_i32 = arith.constant 0 : i32
    %c0_i32_0 = arith.constant 0 : i32
    return %arg0, %arg1, %c0_i32 : i32, i32, i32
  }
  func.func @transform_7(%arg0: i32, %arg1: i32) -> (i32, i32, i32) {
    %c0_i32 = arith.constant 0 : i32
    %c0_i32_0 = arith.constant 0 : i32
    return %arg0, %arg1, %c0_i32 : i32, i32, i32
  }
}

module attributes {stable_mosaic.version = 11 : i64} {
  func.func @_ffn_kernel(%arg0: i32, %arg1: i32, %arg2: memref<8x32xf32, #tpu.memory_space<vmem>>, %arg3: memref<1x32xf32, #tpu.memory_space<vmem>>, %arg4: memref<1x32xf32, #tpu.memory_space<vmem>>, %arg5: memref<32x128xbf16, #tpu.memory_space<vmem>>, %arg6: memref<1x128xf32, #tpu.memory_space<vmem>>, %arg7: memref<128x32xbf16, #tpu.memory_space<vmem>>, %arg8: memref<1x32xf32, #tpu.memory_space<vmem>>, %arg9: memref<8x32xf32, #tpu.memory_space<vmem>>, %arg10: memref<8x32xf32, #tpu.memory_space<vmem>>, %arg11: memref<8x32xf32, #tpu.memory_space<vmem>>) attributes {dimension_semantics = [#tpu.dimension_semantics<parallel>, #tpu.dimension_semantics<arbitrary>], iteration_bounds = array<i64: 2, 1>, scalar_prefetch = 0 : i64, scratch_operands = 2 : i64, tpu.core_type = #tpu.core_type<tc>, window_params = [{transform_indices = @transform_0, window_bounds = array<i64: 8, 32>}, {pipeline_mode = #tpu.pipeline_mode<synchronous>, transform_indices = @transform_1, window_bounds = array<i64: 1, 32>}, {pipeline_mode = #tpu.pipeline_mode<synchronous>, transform_indices = @transform_2, window_bounds = array<i64: 1, 32>}, {transform_indices = @transform_3, window_bounds = array<i64: 32, 128>}, {transform_indices = @transform_4, window_bounds = array<i64: 1, 128>}, {transform_indices = @transform_5, window_bounds = array<i64: 128, 32>}, {pipeline_mode = #tpu.pipeline_mode<synchronous>, transform_indices = @transform_6, window_bounds = array<i64: 1, 32>}, {transform_indices = @transform_7, window_bounds = array<i64: 8, 32>}]} {
    %c0_i32 = arith.constant 0 : i32
    %0 = arith.cmpi eq, %arg1, %c0_i32 : i32
    %1 = arith.extui %0 : i1 to i32
    %c0_i32_0 = arith.constant 0 : i32
    %2 = arith.cmpi ne, %1, %c0_i32_0 : i32
    scf.if %2 {
      %c0_16 = arith.constant 0 : index
      %c0_17 = arith.constant 0 : index
      %21 = vector.load %arg2[%c0_16, %c0_17] : memref<8x32xf32, #tpu.memory_space<vmem>>, vector<8x32xf32>
      %cst_18 = arith.constant dense<0.000000e+00> : vector<8xf32>
      %22 = vector.multi_reduction <add>, %21, %cst_18 [1] : vector<8x32xf32> to vector<8xf32>
      %23 = vector.shape_cast %22 : vector<8xf32> to vector<8x1xf32>
      %cst_19 = arith.constant 3.200000e+01 : f32
      %24 = vector.broadcast %cst_19 : f32 to vector<8x1xf32>
      %25 = arith.divf %23, %24 : vector<8x1xf32>
      %26 = vector.broadcast %25 : vector<8x1xf32> to vector<8x32xf32>
      %27 = arith.subf %21, %26 : vector<8x32xf32>
      %28 = arith.mulf %27, %27 : vector<8x32xf32>
      %cst_20 = arith.constant dense<0.000000e+00> : vector<8xf32>
      %29 = vector.multi_reduction <add>, %28, %cst_20 [1] : vector<8x32xf32> to vector<8xf32>
      %30 = vector.shape_cast %29 : vector<8xf32> to vector<8x1xf32>
      %cst_21 = arith.constant 3.200000e+01 : f32
      %31 = vector.broadcast %cst_21 : f32 to vector<8x1xf32>
      %32 = arith.divf %30, %31 : vector<8x1xf32>
      %cst_22 = arith.constant 9.99999974E-6 : f32
      %33 = vector.broadcast %cst_22 : f32 to vector<8x1xf32>
      %34 = arith.addf %32, %33 : vector<8x1xf32>
      %35 = math.rsqrt %34 : vector<8x1xf32>
      %36 = vector.broadcast %35 : vector<8x1xf32> to vector<8x32xf32>
      %37 = arith.mulf %27, %36 : vector<8x32xf32>
      %c0_23 = arith.constant 0 : index
      %c0_24 = arith.constant 0 : index
      %38 = vector.load %arg3[%c0_23, %c0_24] : memref<1x32xf32, #tpu.memory_space<vmem>>, vector<1x32xf32>
      %39 = vector.broadcast %38 : vector<1x32xf32> to vector<8x32xf32>
      %40 = arith.mulf %37, %39 : vector<8x32xf32>
      %c0_25 = arith.constant 0 : index
      %c0_26 = arith.constant 0 : index
      %41 = vector.load %arg4[%c0_25, %c0_26] : memref<1x32xf32, #tpu.memory_space<vmem>>, vector<1x32xf32>
      %42 = vector.broadcast %41 : vector<1x32xf32> to vector<8x32xf32>
      %43 = arith.addf %40, %42 : vector<8x32xf32>
      %c0_27 = arith.constant 0 : index
      %c0_28 = arith.constant 0 : index
      %44 = vector.load %arg10[%c0_27, %c0_28] : memref<8x32xf32, #tpu.memory_space<vmem>>, vector<8x32xf32>
      tpu.vector_store %arg10[%c0_27, %c0_28], %43 {strides = array<i32>} : memref<8x32xf32, #tpu.memory_space<vmem>>, vector<8x32xf32>,
      %cst_29 = arith.constant 0.000000e+00 : f32
      %45 = vector.broadcast %cst_29 : f32 to vector<8x32xf32>
      %c0_30 = arith.constant 0 : index
      %c0_31 = arith.constant 0 : index
      %46 = vector.load %arg11[%c0_30, %c0_31] : memref<8x32xf32, #tpu.memory_space<vmem>>, vector<8x32xf32>
      tpu.vector_store %arg11[%c0_30, %c0_31], %45 {strides = array<i32>} : memref<8x32xf32, #tpu.memory_space<vmem>>, vector<8x32xf32>,
    } else {
    }
    %c0 = arith.constant 0 : index
    %c0_1 = arith.constant 0 : index
    %3 = vector.load %arg10[%c0, %c0_1] : memref<8x32xf32, #tpu.memory_space<vmem>>, vector<8x32xf32>
    %4 = arith.truncf %3 : vector<8x32xf32> to vector<8x32xbf16>
    %c0_2 = arith.constant 0 : index
    %c0_3 = arith.constant 0 : index
    %5 = vector.load %arg5[%c0_2, %c0_3] : memref<32x128xbf16, #tpu.memory_space<vmem>>, vector<32x128xbf16>
    %cst = arith.constant dense<0.000000e+00> : vector<8x128xf32>
    %6 = tpu.matmul %4, %5, %cst {dimension_numbers = #tpu.dot_dimension_numbers<[1], [0], [0], [1], [0, 0, 1, 1], [], []>} : vector<8x32xbf16>, vector<32x128xbf16>, vector<8x128xf32> -> vector<8x128xf32>
    %c0_4 = arith.constant 0 : index
    %c0_5 = arith.constant 0 : index
    %7 = vector.load %arg6[%c0_4, %c0_5] : memref<1x128xf32, #tpu.memory_space<vmem>>, vector<1x128xf32>
    %8 = vector.broadcast %7 : vector<1x128xf32> to vector<8x128xf32>
    %9 = arith.addf %6, %8 : vector<8x128xf32>
    %cst_6 = arith.constant 0.000000e+00 : f32
    %10 = vector.broadcast %cst_6 : f32 to vector<8x128xf32>
    %11 = arith.maximumf %9, %10 : vector<8x128xf32>
    %c0_7 = arith.constant 0 : index
    %c0_8 = arith.constant 0 : index
    %12 = vector.load %arg11[%c0_7, %c0_8] : memref<8x32xf32, #tpu.memory_space<vmem>>, vector<8x32xf32>
    %13 = arith.truncf %11 : vector<8x128xf32> to vector<8x128xbf16>
    %c0_9 = arith.constant 0 : index
    %c0_10 = arith.constant 0 : index
    %14 = vector.load %arg7[%c0_9, %c0_10] : memref<128x32xbf16, #tpu.memory_space<vmem>>, vector<128x32xbf16>
    %cst_11 = arith.constant dense<0.000000e+00> : vector<8x32xf32>
    %15 = tpu.matmul %13, %14, %cst_11 {dimension_numbers = #tpu.dot_dimension_numbers<[1], [0], [0], [1], [0, 0, 1, 1], [], []>} : vector<8x128xbf16>, vector<128x32xbf16>, vector<8x32xf32> -> vector<8x32xf32>
    %16 = arith.addf %12, %15 : vector<8x32xf32>
    %c0_12 = arith.constant 0 : index
    %c0_13 = arith.constant 0 : index
    %17 = vector.load %arg11[%c0_12, %c0_13] : memref<8x32xf32, #tpu.memory_space<vmem>>, vector<8x32xf32>
    tpu.vector_store %arg11[%c0_12, %c0_13], %16 {strides = array<i32>} : memref<8x32xf32, #tpu.memory_space<vmem>>, vector<8x32xf32>,
    %c0_i32_14 = arith.constant 0 : i32
    %18 = arith.cmpi eq, %arg1, %c0_i32_14 : i32
    %19 = arith.extui %18 : i1 to i32
    %c0_i32_15 = arith.constant 0 : i32
    %20 = arith.cmpi ne, %19, %c0_i32_15 : i32
    scf.if %20 {
      %c0_16 = arith.constant 0 : index
      %c0_17 = arith.constant 0 : index
      %21 = vector.load %arg11[%c0_16, %c0_17] : memref<8x32xf32, #tpu.memory_space<vmem>>, vector<8x32xf32>
      %c0_18 = arith.constant 0 : index
      %c0_19 = arith.constant 0 : index
      %22 = vector.load %arg8[%c0_18, %c0_19] : memref<1x32xf32, #tpu.memory_space<vmem>>, vector<1x32xf32>
      %23 = vector.broadcast %22 : vector<1x32xf32> to vector<8x32xf32>
      %24 = arith.addf %21, %23 : vector<8x32xf32>
      %c0_20 = arith.constant 0 : index
      %c0_21 = arith.constant 0 : index
      %25 = vector.load %arg2[%c0_20, %c0_21] : memref<8x32xf32, #tpu.memory_space<vmem>>, vector<8x32xf32>
      %26 = arith.addf %24, %25 : vector<8x32xf32>
      %c0_22 = arith.constant 0 : index
      %c0_23 = arith.constant 0 : index
      %27 = vector.load %arg9[%c0_22, %c0_23] : memref<8x32xf32, #tpu.memory_space<vmem>>, vector<8x32xf32>
      tpu.vector_store %arg9[%c0_22, %c0_23], %26 {strides = array<i32>} : memref<8x32xf32, #tpu.memory_space<vmem>>, vector<8x32xf32>,
    } else {
    }
    return
  }
  func.func @transform_0(%arg0: i32, %arg1: i32) -> (i32, i32) {
    %c0_i32 = arith.constant 0 : i32
    %c0_i32_0 = arith.constant 0 : i32
    return %arg0, %c0_i32 : i32, i32
  }
  func.func @transform_1(%arg0: i32, %arg1: i32) -> (i32, i32) {
    %c0_i32 = arith.constant 0 : i32
    %c0_i32_0 = arith.constant 0 : i32
    %c0_i32_1 = arith.constant 0 : i32
    return %c0_i32, %c0_i32_0 : i32, i32
  }
  func.func @transform_2(%arg0: i32, %arg1: i32) -> (i32, i32) {
    %c0_i32 = arith.constant 0 : i32
    %c0_i32_0 = arith.constant 0 : i32
    %c0_i32_1 = arith.constant 0 : i32
    return %c0_i32, %c0_i32_0 : i32, i32
  }
  func.func @transform_3(%arg0: i32, %arg1: i32) -> (i32, i32) {
    %c0_i32 = arith.constant 0 : i32
    %c0_i32_0 = arith.constant 0 : i32
    return %c0_i32, %arg1 : i32, i32
  }
  func.func @transform_4(%arg0: i32, %arg1: i32) -> (i32, i32) {
    %c0_i32 = arith.constant 0 : i32
    %c0_i32_0 = arith.constant 0 : i32
    return %c0_i32, %arg1 : i32, i32
  }
  func.func @transform_5(%arg0: i32, %arg1: i32) -> (i32, i32) {
    %c0_i32 = arith.constant 0 : i32
    %c0_i32_0 = arith.constant 0 : i32
    return %arg1, %c0_i32 : i32, i32
  }
  func.func @transform_6(%arg0: i32, %arg1: i32) -> (i32, i32) {
    %c0_i32 = arith.constant 0 : i32
    %c0_i32_0 = arith.constant 0 : i32
    %c0_i32_1 = arith.constant 0 : i32
    return %c0_i32, %c0_i32_0 : i32, i32
  }
  func.func @transform_7(%arg0: i32, %arg1: i32) -> (i32, i32) {
    %c0_i32 = arith.constant 0 : i32
    %c0_i32_0 = arith.constant 0 : i32
    return %arg0, %c0_i32 : i32, i32
  }
}

</mosaic_0001>

<bundles_post_ra>
// kernel: decoder_layer.5
= control target key start
LH: loop header
LB: loop body
LE: loop exit
PB: predicated region body
PF: predicated region fallthrough
CT: control target
= control target key end

     0   :  { %s979_s13 = smov 0   ;;  %s981_s14 = smov 0   ;;  %s1054_s0 = inlined_call_operand.vmem [shape: f32[2,8,32], index: 0, kind: input, shape index: {}]   ;;  %s1055_s1 = inlined_call_operand.vmem [shape: f32[1,32], index: 1, kind: input, shape index: {}]   ;;  %s1056_s2 = inlined_call_operand.vmem [shape: f32[1,32], index: 2, kind: input, shape index: {}]   ;;  %s1057_s3 = inlined_call_operand.vmem [shape: bf16[32,96], index: 3, kind: input, shape index: {}]   ;;  %s1058_s4 = inlined_call_operand.vmem [shape: f32[1,96], index: 4, kind: input, shape index: {}]   ;;  %s1059_s5 = inlined_call_operand.vmem [shape: f32[8,32], index: 5, kind: input, shape index: {}]   ;;  %s1060_s6 = inlined_call_operand.vmem [shape: f32[8,32], index: 6, kind: input, shape index: {}]   ;;  %s1061_s7 = inlined_call_operand.vmem [shape: f32[8,32], index: 7, kind: input, shape index: {}]   ;;  %s1062_s8 = inlined_call_operand.vmem [shape: bf16[2,8,32], index: 8, kind: output, shape index: {0}]   ;;  %s1063_s9 = inlined_call_operand.vmem [shape: bf16[2,8,32], index: 9, kind: output, shape index: {1}]   ;;  %s1064_s10 = inlined_call_operand.vmem [shape: bf16[2,8,32], index: 10, kind: output, shape index: {2}]  }
   0x1   :  { %s983_s15 = smov 0  }
   0x2 LB: > { %s33_s16 = sadd.s32 1, %s910_s14  ;;  %p835_p0 = scmp.ge.s32.totalorder %s914_s15, 1  ;;  %s914_s15 = sphi %s983_s15, %s21_s15   ;;  %s910_s14 = sphi %s981_s14, %s1066_s14   ;;  %s906_s13 = sphi %s979_s13, %s1065_s13  }
   0x3   : > { %p35_p1 = scmp.ge.s32.totalorder %s33_s16, 2  ;;  %p366_p2 = scmp.lt.s32.totalorder %s914_s15, 3 }
   0x5   : > { %s1068_s16 = smov (%p35_p1, %s33_s16), 0  ;;  %p367_p3 = pnand %p835_p0, %p366_p2 }
   0x6   : > { %p434_p4 = scmp.lt.s32.totalorder (!%p367_p3), %s906_s13, 1  ;;  %s917_s11 = smov (!%p367_p3), 32  }
   0x7   : > { %370 = sbr.rel (%p367_p3) target bundleno = 974 (0x3ce), region = 52  ;;  %s918_s12 = smov (!%p367_p3), 96  }
   0x8   : > { %s919_s19 = smov (!%p367_p3), 1   ;;  %s920_s22 = smov (!%p367_p3), 31  }
   0x9   : > { %s921_s25 = smov (!%p367_p3), 97   ;;  %s922_s26 = smov (!%p367_p3), 127  }
   0xa   : > { %s923_s27 = smov (!%p367_p3), 64  }
   0xc   : > { %s1070_s13 = smov (!%p434_p4, %s906_s13), 1  ;;  %vm476_vm0 = vcmask 261120   ;;  %v916_v2 = vmov 32.0   ;;  %v852_v14 = vld [vmem:[%s1057_s3 + $0x8] sm:$0xff]  ;;  %v851_v15 = vld [vmem:[%s1057_s3] sm:$0xff]  ;;  %vm556_vm5 = vcmask 1047808  }
   0xd   : > { %s836_s17 = sshll.u32 %s1070_s13, 3  ;;  %888 = vrcp.f32 %v916_v2  ;;  %546 = vmatpush.bf16.msra.mxu0 %v852_v14  ;;  %v885_v25 = vld [vmem:[%s1055_s1] ss:$0 sm:$0xff]  ;;  %s837_s28 = sshll.u32 %s1070_s13, 2  ;;  %vm585_vm6 = vcmask 257024  }
   0xe   : > { %s440_s20 = scalar_lea.vmem %s1054_s0, %s836_s17  ;;  %v886_v28 = vld [vmem:[%s1056_s2] ss:$0 sm:$0xff]  ;;  %s459_s18 = scalar_lea.vmem %s1062_s8, %s837_s28 }
   0xf   : > { %v475_v0 = vld [vmem:[%s440_s20] sm:$0xff]  ;;  %s466_s21 = scalar_lea.vmem %s1063_s9, %s837_s28 }
  0x10   : > { %v477_v1 = vsel %vm476_vm0, %v475_v0, 0.0  ;;  %v887_v32 = vld [vmem:[%s1058_s4] ss:$0 sm:$0xff] }
  0x11   : > { %478 = vadd.xlane.f32.xlu0 %v477_v1  ;;  %547 = vmatpush.bf16.msra.mxu0 %v851_v15  ;;  %v554_v36 = vld [vmem:[%s1060_s6] sm:$0xff] }
  0x12   : > { %v555_v38 = vld [vmem:[%s1061_s7] sm:$0xff] }
  0x13   : > { %v889_v3 = vpop.eup %888  ;;  %v553_v39 = vld [vmem:[%s1059_s5] sm:$0xff] }
  0x14   : > { %v481_v4 = vmul.f32 32.0, %v889_v3  ;;  %vm485_vm1 = vweird.f32 %v889_v3 }
  0x16   : > { %v482_v5 = vsub.f32 1.0, %v481_v4 }
  0x18   : > { %v483_v6 = vmul.f32 %v889_v3, %v482_v5 }
  0x1a   : > { %v484_v7 = vadd.f32 %v889_v3, %v483_v6 }
  0x1c   : > { %v486_v8 = vsel %vm485_vm1, %v889_v3, %v484_v7 }
  0x84   : > { %v479_v9 = vpop.xlane.xlu0 %478 }
  0x85   : > { %v487_v10 = vmul.f32 %v486_v8, %v479_v9 }
  0x87   : > { %v488_v11 = vsub.f32 %v475_v0, %v487_v10 }
  0x89   : > { %v489_v12 = vmul.f32 %v488_v11, %v488_v11 }
  0x8b   : > { %v490_v13 = vsel %vm476_vm0, %v489_v12, 0.0 }
  0x8c   : > { %491 = vadd.xlane.f32.xlu0 %v490_v13 }
  0xa0   : > { %565 = vrot.lane.b32.xlu0 %v554_v36, %s919_s19 }
  0xff   : > { %v492_v16 = vpop.xlane.xlu0 %491 }
 0x100   : > { %v493_v17 = vmul.f32 %v492_v16, %v486_v8 }
 0x102   : > { %v494_v18 = vadd.f32 1e-05, %v493_v17 }
 0x104   : > { %890 = vrsqrt.f32 %v494_v18  ;;  %vm501_vm3 = vweird.f32 %v494_v18 }
 0x10a   : > { %v891_v19 = vpop.eup %890 }
 0x10b   : > { %v496_v20 = vmul.f32 %v891_v19, %v494_v18  ;;  %vm502_vm2 = vweird.f32 %v891_v19 }
 0x10c   : > { %vm503_vm4 = vmor %vm501_vm3, %vm502_vm2 }
 0x10d   : > { %v497_v21 = vmul.f32 %v891_v19, %v496_v20 }
 0x10f   : > { %v498_v22 = vmul.f32 0.5, %v497_v21 }
 0x111   : > { %v499_v23 = vsub.f32 1.5, %v498_v22 }
 0x112   : > { %v566_v44 = vpop.permute.xlu0 %565 }
 0x113   : > { %v500_v24 = vmul.f32 %v891_v19, %v499_v23 }
 0x115   : > { %v504_v26 = vsel %vm503_vm4, %v891_v19, %v500_v24 }
 0x116   : > { %v505_v27 = vmul.f32 %v504_v26, %v488_v11 }
 0x118   : > { %v510_v29 = vmul.f32 %v885_v25, %v505_v27 }
 0x11a   : > { %v515_v30 = vadd.f32 %v886_v28, %v510_v29 }
 0x11c   : > { %v516_v31 = vpack.c.bf16 %v515_v30, %v515_v30 }
 0x11e   : > { %848 = vmatmul.msk.bf16.vlgmr.msra.gmra.mxu0 %vm476_vm0, %v516_v31 }
 0x19b   : > { %v549_v33 = vpop.f32.mrf.mxu0 }
 0x19c   : > { %v550_v34 = vadd.f32 %v887_v32, %v549_v33 }
 0x19e   : > { %557 = vrot.lane.b32.xlu2 %v550_v34, %s917_s11  ;;  %588 = vrot.lane.b32.xlu1 %v550_v34, %s918_s12  ;;  %v620_v54 = vpack.c.bf16 %v550_v34, %v550_v34  ;;  %v563_v0 = vmul.f32 %v553_v39, %v550_v34 }
 0x1a3   : > { %v551_v35 = vpop.f32.mrf.mxu0 }
 0x1f8   : > { %v558_v42 = vpop.permute.xlu2 %557 }
 0x1f9   : > { %v559_v43 = vsel %vm556_vm5, %v558_v42, %v550_v34 }
 0x210   : > { %v589_v37 = vpop.permute.xlu1 %588 }
 0x211   : > { %591 = vrot.lane.b32.xlu1 %v589_v37, %s917_s11 }
 0x219   : > { %575 = vrot.lane.b32.xlu1 %v555_v38, %s920_s22 }
 0x221   : > { %598 = vrot.lane.b32.xlu1 %v553_v39, %s917_s11 }
 0x283   : > { %v592_v40 = vpop.permute.xlu1 %591 }
 0x284   : > { %v593_v41 = vsel %vm556_vm5, %v592_v40, %v589_v37 }
 0x285   : > { %594 = vrot.lane.b32.xlu2 %v593_v41, %s917_s11 }
 0x28b   : > { %v576_v46 = vpop.permute.xlu1 %575 }
 0x28d   : > { %560 = vrot.lane.b32.xlu2 %v559_v43, %s917_s11  ;;  %s473_s11 = scalar_lea.vmem %s1064_s10, %s837_s28 }
 0x293   : > { %v599_v57 = vpop.permute.xlu1 %598 }
 0x294   : > { %v601_v59 = vmul.f32 %v599_v57, %v550_v34 }
 0x2df   : > { %v595_v45 = vpop.permute.xlu2 %594 }
 0x2e0   : > { %v596_v47 = vsel %vm556_vm5, %v595_v45, %v589_v37 }
 0x2e1   : > { %v608_v48 = vmul.f32 %v596_v47, %v576_v46  ;;  %v602_v49 = vmul.f32 %v596_v47, %v566_v44 }
 0x2e3   : > { %610 = vrot.lane.b32.xlu1 %v608_v48, %s919_s19  ;;  %604 = vrot.lane.b32.xlu2 %v602_v49, %s920_s22 }
 0x2e7   : > { %v561_v50 = vpop.permute.xlu2 %560 }
 0x2e8   : > { %v562_v51 = vsel %vm556_vm5, %v561_v50, %v550_v34 }
 0x2e9   : > { %v568_v52 = vmul.f32 %v566_v44, %v562_v51  ;;  %v578_v53 = vmul.f32 %v576_v46, %v562_v51 }
 0x2eb   : > { %580 = vrot.lane.b32.xlu0 %v578_v53, %s921_s25  ;;  %570 = vrot.lane.b32.xlu2 %v568_v52, %s922_s26 }
 0x2f3   : > { %622 = vrot.lane.b32.xlu2 %v620_v54, %s923_s27 }
 0x33d   : > { %v605_v55 = vpop.permute.xlu2 %604 }
 0x33e   : > { %v607_v60 = vadd.f32 %v605_v55, %v601_v59 }
 0x345   : > { %v571_v56 = vpop.permute.xlu2 %570 }
 0x346   : > { %v573_v1 = vadd.f32 %v571_v56, %v563_v0 }
 0x34d   : > { %v623_v58 = vpop.permute.xlu2 %622 }
 0x34e   : > { %625 = vst.msk [vmem:[%s473_s11] sm:$0xf] %vm585_vm6, %v623_v58 }
 0x355   : > { %v611_v61 = vpop.permute.xlu1 %610 }
 0x356   : > { %v613_v62 = vadd.f32 %v611_v61, %v607_v60 }
 0x358   : > { %v614_v63 = vpack.c.bf16 %v613_v62, %v613_v62 }
 0x35a   : > { %616 = vrot.lane.b32.xlu1 %v614_v63, %s918_s12 }
 0x35d   : > { %v581_v2 = vpop.permute.xlu0 %580 }
 0x35e   : > { %v583_v3 = vadd.f32 %v581_v2, %v573_v1 }
 0x360   : > { %v584_v4 = vpack.c.bf16 %v583_v3, %v583_v3 }
 0x362   : > { %586 = vst.msk [vmem:[%s459_s18] sm:$0xf] %vm585_vm6, %v584_v4 }
 0x3cc   : > { %v617_v5 = vpop.permute.xlu1 %616 }
 0x3cd   : > { %619 = vst.msk [vmem:[%s466_s21] sm:$0xf] %vm585_vm6, %v617_v5 }
 0x3ce PF: > { %s21_s15 = sadd.s32 1, %s914_s15   ;;  %s1065_s13 = smov %s910_s14 }
 0x3cf   : > { %p18_p5 = scmp.ge.s32.totalorder %s21_s15, 4   ;;  %s1066_s14 = smov %s1068_s16 }
 0x3d1   :  { %20 = sbr.rel (!%p18_p5) target bundleno = 2 (0x2), region = 115 }

// kernel: decoder_layer.6
= control target key start
LH: loop header
LB: loop body
LE: loop exit
PB: predicated region body
PF: predicated region fallthrough
CT: control target
= control target key end

     0   :  { %s956_s24 = smov 0   ;;  %s958_s25 = smov 0   ;;  %s1058_s0 = inlined_call_operand.vmem [shape: bf16[2,8,32], index: 0, kind: input, shape index: {}]   ;;  %s1059_s1 = inlined_call_operand.vmem [shape: bf16[2,8,32], index: 1, kind: input, shape index: {}]   ;;  %s1060_s2 = inlined_call_operand.vmem [shape: bf16[2,8,32], index: 2, kind: input, shape index: {}]   ;;  %s1061_s3 = inlined_call_operand.vmem [shape: f32[2,1,8], index: 3, kind: input, shape index: {}]   ;;  %s1062_s4 = inlined_call_operand.vmem [shape: bf16[32,32], index: 4, kind: input, shape index: {}]   ;;  %s1063_s5 = inlined_call_operand.vmem [shape: f32[1,32], index: 5, kind: input, shape index: {}]   ;;  %s1064_s6 = inlined_call_operand.vmem [shape: f32[2,8,32], index: 6, kind: input, shape index: {}]   ;;  %s1065_s7 = inlined_call_operand.vmem [shape: f32[2,8,32], index: 7, kind: output, shape index: {}]  }
   0x1   :  { %s960_s26 = smov 0  }
   0x2 LB: > { %s29_s27 = sadd.s32 1, %s904_s25  ;;  %p811_p0 = scmp.ge.s32.totalorder %s908_s26, 1  ;;  %s908_s26 = sphi %s960_s26, %s17_s26   ;;  %s904_s25 = sphi %s958_s25, %s1067_s25   ;;  %s900_s24 = sphi %s956_s24, %s1066_s24  }
   0x3   : > { %p31_p1 = scmp.ge.s32.totalorder %s29_s27, 2  ;;  %p295_p2 = scmp.lt.s32.totalorder %s908_s26, 3 }
   0x5   : > { %s1069_s27 = smov (%p31_p1, %s29_s27), 0  ;;  %p296_p3 = pnand %p811_p0, %p295_p2 }
   0x6   : > { %p349_p4 = scmp.lt.s32.totalorder (!%p296_p3), %s900_s24, 1  ;;  %s910_s15 = smov (!%p296_p3), 112  }
   0x7   : > { %299 = sbr.rel (%p296_p3) target bundleno = 1219 (0x4c3), region = 48  ;;  %s911_s16 = smov (!%p296_p3), 104  }
   0x8   : > { %s912_s17 = smov (!%p296_p3), 120   ;;  %s913_s21 = smov (!%p296_p3), 8  }
   0x9   : > { %s914_s22 = smov (!%p296_p3), 16   ;;  %s915_s23 = smov (!%p296_p3), 24  }
   0xc   : > { %s1071_s24 = smov (!%p349_p4, %s900_s24), 1  ;;  %vm389_vm0 = vcmask 64512   ;;  %vm424_vm1 = vcmask 1043456   ;;  %vm640_vm2 = vcmask 130048   ;;  %vm643_vm3 = vcmask 195584  }
   0xd   : > { %s977_s28 = sshll.u32 %s1071_s24, 2  ;;  %s366_s8 = scalar_lea.vmem %s1061_s3, %s1071_s24  ;;  %vm666_vm4 = vcmask 261120  }
   0xe   : > { %s359_s11 = scalar_lea.vmem %s1059_s1, %s977_s28  ;;  %s355_s14 = scalar_lea.vmem %s1058_s0, %s977_s28  ;;  %v868_v7 = vld [vmem:[%s366_s8] ss:$0 sm:$0xff] }
   0xf   : > { %v384_v0 = vld [vmem:[%s359_s11] sm:$0xf]  ;;  %s363_s20 = scalar_lea.vmem %s1060_s2, %s977_s28  ;;  %s815_s9 = sshll.u32 %s1071_s24, 3 }
  0x10   : > { %v394_v1 = vsel %vm389_vm0, %v384_v0, 0  ;;  %v383_v2 = vld [vmem:[%s355_s14] sm:$0xf]  ;;  %v448_v3 = vunpack.c.l.b16 %v384_v0  ;;  %s373_s12 = scalar_lea.vmem %s1064_s6, %s815_s9 }
  0x11   : > { %403 = vmatpush.bf16.xpose.msra.mxu0 %v394_v1  ;;  %v443_v5 = vunpack.c.l.b16 %v383_v2  ;;  %v385_v22 = vld [vmem:[%s363_s20] sm:$0xf] }
  0x12   : > { %v449_v4 = vpack.c.b16 %v448_v3, %v448_v3  ;;  %v426_v23 = vsel %vm424_vm1, %v385_v22, 0  ;;  %v484_v46 = vunpack.c.l.b16 %v385_v22 }
  0x13   : > { %v444_v6 = vpack.c.b16 %v443_v5, %v443_v5  ;;  %435 = vmatpush.bf16.msra.mxu1 %v426_v23 }
  0x14   : > { %510 = vrot.lane.b32.xlu2 %v449_v4, %s910_s15  ;;  %v485_v47 = vpack.c.b16 %v484_v46, %v484_v46 }
  0x18   : > { %817 = vmatmul.msk.bf16.vlgmr.msra.gmra.mxu0 %vm389_vm0, %v383_v2 }
  0x1c   : > { %567 = vrot.lane.b32.xlu2 %v449_v4, %s911_s16 }
  0x24   : > { %508 = vrot.lane.b32.xlu2 %v444_v6, %s910_s15 }
  0x2c   : > { %565 = vrot.lane.b32.xlu2 %v444_v6, %s911_s16 }
  0x6e   : > { %v511_v12 = vpop.permute.xlu2 %510 }
  0x6f   : > { %v516_v24 = vsel %vm389_vm0, %v511_v12, 0 }
  0x70   : > { %525 = vmatpush.bf16.xpose.msrb.mxu1 %v516_v24 }
  0x76   : > { %v568_v13 = vpop.permute.xlu2 %567 }
  0x77   : > { %v573_v18 = vsel %vm389_vm0, %v568_v13, 0 }
  0x78   : > { %582 = vmatpush.bf16.xpose.msrb.mxu0 %v573_v18 }
  0x7e   : > { %v509_v17 = vpop.permute.xlu2 %508 }
  0x86   : > { %v566_v21 = vpop.permute.xlu2 %565 }
  0x87   : > { %823 = vmatmul.msk.bf16.vlgmr.msrb.gmra.mxu0 %vm389_vm0, %v566_v21 }
  0x95   : > { %v405_v8 = vpop.f32.mrf.mxu0 }
  0x96   : > { %v406_v9 = vadd.f32 %v868_v7, %v405_v8 }
  0x98   : > { %v409_v10 = vsel %vm389_vm0, %v406_v9, -inf }
  0x99   : > { %410 = vmax.xlane.f32.xlu0 %v409_v10 }
  0x9d   : > { %v407_v11 = vpop.f32.mrf.mxu0 }
  0xad   : > { %450 = vrot.lane.b32.xlu0 %v449_v4, %s912_s17 }
 0x104   : > { %v584_v31 = vpop.f32.mrf.mxu0 }
 0x105   : > { %v585_v32 = vadd.f32 %v868_v7, %v584_v31 }
 0x107   : > { %v588_v33 = vsel %vm389_vm0, %v585_v32, -inf }
 0x10c   : > { %v411_v14 = vpop.xlane.xlu0 %410  ;;  %v586_v34 = vpop.f32.mrf.mxu0 }
 0x10d   : > { %v412_v15 = vsub.f32 %v406_v9, %v411_v14 }
 0x10f   : > { %v413_v16 = vmul.f32 1.442695, %v412_v15 }
 0x111   : > { %870 = vpow2.f32 %v413_v16 }
 0x117   : > { %v871_v19 = vpop.eup %870 }
 0x118   : > { %v415_v20 = vsel %vm389_vm0, %v871_v19, 0.0 }
 0x119   : > { %416 = vadd.xlane.f32.xlu1 %v415_v20 }
 0x11f   : > { %v451_v25 = vpop.permute.xlu0 %450 }
 0x120   : > { %v456_v26 = vsel %vm389_vm0, %v451_v25, 0 }
 0x121   : > { %465 = vmatpush.bf16.xpose.msra.mxu2 %v456_v26 }
 0x132   : > { %445 = vrot.lane.b32.xlu1 %v444_v6, %s912_s17 }
 0x15c   : > { %589 = vmax.xlane.f32.xlu1 %v588_v33  ;;  %v836_v33 = vld [vmem:[%s1062_s4] sm:$0xff] }
 0x18c   : > { %v417_v27 = vpop.xlane.xlu1 %416 }
 0x18d   : > { %872 = vrcp.f32 %v417_v27 }
 0x193   : > { %v873_v28 = vpop.eup %872 }
 0x194   : > { %v419_v29 = vmul.f32 %v873_v28, %v871_v19 }
 0x196   : > { %v420_v30 = vpack.c.bf16 %v419_v29, %v419_v29 }
 0x198   : > { %818 = vmatmul.msk.bf16.vlgmr.msra.gmra.mxu1 %vm389_vm0, %v420_v30 }
 0x1a4   : > { %v446_v35 = vpop.permute.xlu1 %445 }
 0x1a5   : > { %819 = vmatmul.msk.bf16.vlgmr.msra.gmra.mxu2 %vm389_vm0, %v446_v35 }
 0x1a8   : > { %821 = vmatmul.msk.bf16.vlgmr.msrb.gmra.mxu1 %vm389_vm0, %v509_v17 }
 0x1cf   : > { %v590_v50 = vpop.xlane.xlu1 %589 }
 0x1d0   : > { %v591_v54 = vsub.f32 %v585_v32, %v590_v50  ;;  %v837_v32 = vld [vmem:[%s1062_s4 + $0x8] sm:$0xff] }
 0x1d1   : > { %675 = vmatpush.bf16.msra.mxu1 %v837_v32 }
 0x1d2   : > { %v592_v56 = vmul.f32 1.442695, %v591_v54 }
 0x1d5   : > { %676 = vmatpush.bf16.msra.mxu1 %v836_v33 }
 0x215   : > { %v1014_v36 = vpop.f32.mrf.mxu1 }
 0x216   : > { %v441_v35 = vpack.c.bf16 %v1014_v36, %v1014_v36 }
 0x21d   : > { %v439_v37 = vpop.f32.mrf.mxu1 }
 0x225   : > { %v527_v38 = vpop.f32.mrf.mxu1 }
 0x226   : > { %v528_v39 = vadd.f32 %v868_v7, %v527_v38 }
 0x228   : > { %v467_v40 = vpop.f32.mrf.mxu2  ;;  %v531_v41 = vsel %vm389_vm0, %v528_v39, -inf }
 0x229   : > { %v468_v42 = vadd.f32 %v868_v7, %v467_v40  ;;  %532 = vmax.xlane.f32.xlu2 %v531_v41 }
 0x22b   : > { %v471_v43 = vsel %vm389_vm0, %v468_v42, -inf }
 0x22c   : > { %472 = vmax.xlane.f32.xlu0 %v471_v43  ;;  %v682_v43 = vld [vmem:[%s373_s12] sm:$0xff] }
 0x22d   : > { %v529_v44 = vpop.f32.mrf.mxu1 }
 0x230   : > { %v469_v45 = vpop.f32.mrf.mxu2 }
 0x241   : > { %486 = vrot.lane.b32.xlu2 %v485_v47, %s912_s17  ;;  %s380_s17 = scalar_lea.vmem %s1065_s7, %s815_s9 }
 0x29c   : > { %v533_v48 = vpop.xlane.xlu2 %532 }
 0x29d   : > { %v534_v49 = vsub.f32 %v528_v39, %v533_v48 }
 0x29f   : > { %v535_v51 = vmul.f32 1.442695, %v534_v49  ;;  %v473_v52 = vpop.xlane.xlu0 %472 }
 0x2a0   : > { %v474_v53 = vsub.f32 %v468_v42, %v473_v52  ;;  %v869_v42 = vld [vmem:[%s1063_s5] ss:$0 sm:$0xff] }
 0x2a1   : > { %874 = vpow2.f32 %v535_v51 }
 0x2a2   : > { %v475_v55 = vmul.f32 1.442695, %v474_v53 }
 0x2a4   : > { %876 = vpow2.f32 %v475_v55  ;;  %v487_v63 = vpop.permute.xlu2 %486 }
 0x2a5   : > { %878 = vpow2.f32 %v592_v56  ;;  %v492_v0 = vsel %vm424_vm1, %v487_v63, 0 }
 0x2a6   : > { %501 = vmatpush.bf16.msra.mxu3 %v492_v0 }
 0x2a7   : > { %v875_v57 = vpop.eup %874 }
 0x2a8   : > { %v537_v58 = vsel %vm389_vm0, %v875_v57, 0.0 }
 0x2a9   : > { %538 = vadd.xlane.f32.xlu1 %v537_v58 }
 0x2aa   : > { %v877_v59 = vpop.eup %876 }
 0x2ab   : > { %v477_v60 = vsel %vm389_vm0, %v877_v59, 0.0  ;;  %v879_v61 = vpop.eup %878 }
 0x2ac   : > { %478 = vadd.xlane.f32.xlu0 %v477_v60  ;;  %v594_v62 = vsel %vm389_vm0, %v879_v61, 0.0 }
 0x2b4   : > { %595 = vadd.xlane.f32.xlu0 %v594_v62 }
 0x2c2   : > { %543 = vrot.lane.b32.xlu1 %v485_v47, %s910_s15 }
 0x2c8   : > { %600 = vrot.lane.b32.xlu0 %v485_v47, %s911_s16 }
 0x31c   : > { %v539_v4 = vpop.xlane.xlu1 %538 }
 0x31f   : > { %v479_v1 = vpop.xlane.xlu0 %478 }
 0x320   : > { %880 = vrcp.f32 %v479_v1 }
 0x321   : > { %882 = vrcp.f32 %v539_v4 }
 0x326   : > { %v881_v2 = vpop.eup %880 }
 0x327   : > { %v481_v3 = vmul.f32 %v881_v2, %v877_v59  ;;  %v596_v6 = vpop.xlane.xlu0 %595  ;;  %v883_v7 = vpop.eup %882 }
 0x328   : > { %884 = vrcp.f32 %v596_v6  ;;  %v541_v9 = vmul.f32 %v883_v7, %v875_v57 }
 0x329   : > { %v482_v5 = vpack.c.bf16 %v481_v3, %v481_v3 }
 0x32a   : > { %v542_v13 = vpack.c.bf16 %v541_v9, %v541_v9 }
 0x32b   : > { %820 = vmatmul.msk.bf16.vlgmr.msra.gmra.mxu3 %vm389_vm0, %v482_v5 }
 0x32e   : > { %v885_v11 = vpop.eup %884 }
 0x32f   : > { %v598_v12 = vmul.f32 %v885_v11, %v879_v61 }
 0x331   : > { %v599_v16 = vpack.c.bf16 %v598_v12, %v598_v12 }
 0x334   : > { %v544_v8 = vpop.permute.xlu1 %543 }
 0x335   : > { %v549_v10 = vsel %vm424_vm1, %v544_v8, 0 }
 0x336   : > { %558 = vmatpush.bf16.msrb.mxu3 %v549_v10 }
 0x33a   : > { %v601_v14 = vpop.permute.xlu0 %600 }
 0x33b   : > { %822 = vmatmul.msk.bf16.vlgmr.msrb.gmra.mxu3 %vm389_vm0, %v542_v13  ;;  %v606_v15 = vsel %vm424_vm1, %v601_v14, 0 }
 0x33c   : > { %615 = vmatpush.bf16.msrb.mxu2 %v606_v15 }
 0x33f   : > { %824 = vmatmul.msk.bf16.vlgmr.msrb.gmra.mxu2 %vm389_vm0, %v599_v16 }
 0x3ae   : > { %v503_v17 = vpop.f32.mrf.mxu3 }
 0x3af   : > { %v507_v18 = vpack.c.bf16 %v503_v17, %v503_v17 }
 0x3b1   : > { %v623_v19 = vunpack.c.l.b16 %v507_v18 }
 0x3b3   : > { %v624_v20 = vpack.c.b16 %v623_v19, %v623_v19 }
 0x3b5   : > { %625 = vrot.lane.b32.xlu2 %v624_v20, %s913_s21 }
 0x3b6   : > { %v505_v21 = vpop.f32.mrf.mxu3 }
 0x3be   : > { %v560_v22 = vpop.f32.mrf.mxu3 }
 0x3bf   : > { %v564_v23 = vpack.c.bf16 %v560_v22, %v560_v22 }
 0x3c1   : > { %v628_v24 = vunpack.c.l.b16 %v564_v23 }
 0x3c2   : > { %v617_v25 = vpop.f32.mrf.mxu2 }
 0x3c3   : > { %v629_v26 = vpack.c.b16 %v628_v24, %v628_v24  ;;  %v621_v27 = vpack.c.bf16 %v617_v25, %v617_v25 }
 0x3c5   : > { %v633_v28 = vunpack.c.l.b16 %v621_v27  ;;  %630 = vrot.lane.b32.xlu2 %v629_v26, %s914_s22 }
 0x3c6   : > { %v562_v29 = vpop.f32.mrf.mxu3 }
 0x3c7   : > { %v634_v30 = vpack.c.b16 %v633_v28, %v633_v28 }
 0x3c9   : > { %635 = vrot.lane.b32.xlu0 %v634_v30, %s915_s23 }
 0x3ca   : > { %v619_v31 = vpop.f32.mrf.mxu2 }
 0x40f   : > { %v626_v34 = vpop.permute.xlu2 %625 }
 0x410   : > { %v639_v38 = vsel %vm389_vm0, %v441_v35, %v626_v34 }
 0x41f   : > { %v631_v37 = vpop.permute.xlu2 %630 }
 0x420   : > { %v642_v39 = vsel %vm640_vm2, %v639_v38, %v631_v37 }
 0x43b   : > { %v636_v40 = vpop.permute.xlu0 %635 }
 0x43c   : > { %v645_v41 = vsel %vm643_vm3, %v642_v39, %v636_v40 }
 0x43d   : > { %833 = vmatmul.msk.bf16.vlgmr.msra.gmra.mxu1 %vm666_vm4, %v645_v41 }
 0x4ba   : > { %v678_v36 = vpop.f32.mrf.mxu1 }
 0x4bb   : > { %v679_v44 = vadd.f32 %v869_v42, %v678_v36 }
 0x4bd   : > { %v683_v45 = vadd.f32 %v682_v43, %v679_v44 }
 0x4bf   : > { %684 = vst.msk [vmem:[%s380_s17] sm:$0xff] %vm666_vm4, %v683_v45 }
 0x4c2   : > { %v680_v46 = vpop.f32.mrf.mxu1 }
 0x4c3 PF: > { %s17_s26 = sadd.s32 1, %s908_s26   ;;  %s1066_s24 = smov %s904_s25 }
 0x4c4   : > { %p14_p5 = scmp.ge.s32.totalorder %s17_s26, 4   ;;  %s1067_s25 = smov %s1069_s27 }
 0x4c6   :  { %16 = sbr.rel (!%p14_p5) target bundleno = 2 (0x2), region = 90 }

// kernel: decoder_layer.7
= control target key start
LH: loop header
LB: loop body
LE: loop exit
PB: predicated region body
PF: predicated region fallthrough
CT: control target
= control target key end

     0   :  { %s1085_s21 = smov 0   ;;  %s1209_s0 = inlined_call_operand.vmem [shape: f32[2,8,32], index: 0, kind: input, shape index: {}]   ;;  %s1210_s1 = inlined_call_operand.vmem [shape: f32[1,32], index: 1, kind: input, shape index: {}]   ;;  %s1211_s2 = inlined_call_operand.vmem [shape: f32[1,32], index: 2, kind: input, shape index: {}]   ;;  %s1212_s3 = inlined_call_operand.vmem [shape: bf16[32,32], index: 3, kind: input, shape index: {}]   ;;  %s1213_s4 = inlined_call_operand.vmem [shape: f32[1,32], index: 4, kind: input, shape index: {}]   ;;  %s1214_s5 = inlined_call_operand.vmem [shape: f32[8,32], index: 5, kind: input, shape index: {}]   ;;  %s1215_s6 = inlined_call_operand.vmem [shape: f32[8,32], index: 6, kind: input, shape index: {}]   ;;  %s1216_s7 = inlined_call_operand.vmem [shape: f32[8,32], index: 7, kind: input, shape index: {}]   ;;  %s1217_s8 = inlined_call_operand.vmem [shape: f32[2,16,32], index: 8, kind: input, shape index: {}]   ;;  %s1218_s9 = inlined_call_operand.vmem [shape: bf16[32,64], index: 9, kind: input, shape index: {}]   ;;  %s1219_s10 = inlined_call_operand.vmem [shape: f32[1,64], index: 10, kind: input, shape index: {}]   ;;  %s1220_s11 = inlined_call_operand.vmem [shape: f32[16,32], index: 11, kind: input, shape index: {}]   ;;  %s1221_s12 = inlined_call_operand.vmem [shape: f32[16,32], index: 12, kind: input, shape index: {}]   ;;  %s1222_s13 = inlined_call_operand.vmem [shape: f32[16,32], index: 13, kind: input, shape index: {}]   ;;  %s1223_s14 = inlined_call_operand.vmem [shape: bf16[2,8,32], index: 14, kind: output, shape index: {0}]   ;;  %s1224_s15 = inlined_call_operand.vmem [shape: bf16[2,16,32], index: 15, kind: output, shape index: {1}]   ;;  %s1225_s16 = inlined_call_operand.vmem [shape: bf16[2,16,32], index: 16, kind: output, shape index: {2}]  }
   0x1   :  { %1226 = sst [smem:[#allocation2_spill]] %s1209_s0 }
   0x2 LB: > { %s922_s22 = sadd.s32 4294967295, %s991_s21   ;;  %p926_p0 = scmp.ge.s32.totalorder %s991_s21, 1  ;;  %s991_s21 = sphi %s1085_s21, %s27_s21  }
   0x3   : > { %p476_p1 = scmp.lt.s32.totalorder %s991_s21, 3 }
   0x5   : > { %p477_p2 = pnand %p926_p0, %p476_p1 }
   0x6   : > { %p539_p3 = scmp.lt.s32.totalorder (!%p477_p2), %s922_s22, 1  ;;  %s1227_s26 = sld [smem:[#allocation2_spill]] (!%p477_p2) }
   0x7   : > { %480 = sbr.rel (%p477_p2) target bundleno = 783 (0x30f), region = 76  ;;  %s994_s30 = smov (!%p477_p2), 32  }
   0x8   : > { %s995_s25 = smov (!%p477_p2), 1   ;;  %s996_s20 = smov (!%p477_p2), 31  }
   0x9   : > { %s999_s29 = smov (!%p477_p2), 96  }
   0xc   : > { %s1229_s22 = smov (!%p539_p3, %s922_s22), 1  ;;  %vm564_vm0 = vcmask 261120   ;;  %v993_v2 = vmov 32.0   ;;  %v961_v3 = vld [vmem:[%s1218_s9 + $0x8] sm:$0xff]  ;;  %v960_v4 = vld [vmem:[%s1218_s9] sm:$0xff]  ;;  %vm643_vm5 = vcmask 1047808  }
   0xd   : > { %s1096_s23 = sshll.u32 %s1229_s22, 3  ;;  %s955_s28 = sshll.u32 %s1229_s22, 4  ;;  %981 = vrcp.f32 %v993_v2  ;;  %707 = vmatpush.bf16.msra.mxu1 %v961_v3  ;;  %v959_v19 = vld [vmem:[%s1212_s3 + $0x8] sm:$0xff]  ;;  %v958_v20 = vld [vmem:[%s1212_s3] sm:$0xff]  ;;  %vm673_vm6 = vcmask 257024  }
   0xe   : > { %s542_s27 = scalar_lea.vmem %s1227_s26, %s1096_s23  ;;  %s547_s0 = scalar_lea.vmem %s1217_s8, %s955_s28  ;;  %634 = vmatpush.bf16.msra.mxu0 %v959_v19  ;;  %v979_v21 = vld [vmem:[%s1219_s10] ss:$0 sm:$0xff]  ;;  %v732_v43 = vld [vmem:[%s1221_s12 + $0x8] sm:$0xff] }
   0xf   : > { %v563_v0 = vld [vmem:[%s542_s27] sm:$0xff]  ;;  %v676_v6 = vld [vmem:[%s547_s0 + $0x8] sm:$0xff]  ;;  %s997_s28 = smov 127   ;;  %s930_s18 = sshll.u32 %s1229_s22, 2 }
  0x10   : > { %v565_v1 = vsel %vm564_vm0, %v563_v0, 0.0  ;;  %v675_v5 = vld [vmem:[%s547_s0] sm:$0xff]  ;;  %v754_v58 = vld [vmem:[%s1222_s13 + $0x8] sm:$0xff]  ;;  %s556_s0 = scalar_lea.vmem %s1224_s15, %s1096_s23 }
  0x11   : > { %566 = vadd.xlane.f32.xlu0 %v565_v1  ;;  %v677_v8 = vpack.c.bf16 %v676_v6, %v675_v5  ;;  %708 = vmatpush.bf16.msra.mxu1 %v960_v4  ;;  %v977_v35 = vld [vmem:[%s1210_s1] ss:$0 sm:$0xff] }
  0x12   : > { %635 = vmatpush.bf16.msra.mxu0 %v958_v20  ;;  %v978_v38 = vld [vmem:[%s1211_s2] ss:$0 sm:$0xff] }
  0x13   : > { %v982_v7 = vpop.eup %981  ;;  %v650_v42 = vld [vmem:[%s1215_s6] sm:$0xff] }
  0x14   : > { %v569_v9 = vmul.f32 32.0, %v982_v7  ;;  %952 = vmatmul.msk.bf16.vlgmr.msra.gmra.mxu1 %vm564_vm0, %v677_v8  ;;  %vm573_vm1 = vweird.f32 %v982_v7  ;;  %v980_v44 = vld [vmem:[%s1213_s4] ss:$0 sm:$0xff] }
  0x15   : > { %v731_v50 = vld [vmem:[%s1221_s12] sm:$0xff] }
  0x16   : > { %v570_v10 = vsub.f32 1.0, %v569_v9  ;;  %v661_v51 = vld [vmem:[%s1216_s7] sm:$0xff] }
  0x17   : > { %v753_v54 = vld [vmem:[%s1222_s13] sm:$0xff] }
  0x18   : > { %v571_v11 = vmul.f32 %v982_v7, %v570_v10 }
  0x1a   : > { %v572_v12 = vadd.f32 %v982_v7, %v571_v11 }
  0x1c   : > { %v574_v13 = vsel %vm573_vm1, %v982_v7, %v572_v12 }
  0x84   : > { %v567_v14 = vpop.xlane.xlu0 %566 }
  0x85   : > { %v575_v15 = vmul.f32 %v574_v13, %v567_v14 }
  0x87   : > { %v576_v16 = vsub.f32 %v563_v0, %v575_v15  ;;  %v641_v15 = vld [vmem:[%s1214_s5] sm:$0xff] }
  0x89   : > { %v577_v17 = vmul.f32 %v576_v16, %v576_v16 }
  0x8b   : > { %v578_v18 = vsel %vm564_vm0, %v577_v17, 0.0 }
  0x8c   : > { %579 = vadd.xlane.f32.xlu0 %v578_v18 }
  0x91   : > { %v710_v22 = vpop.f32.mrf.mxu1 }
  0x92   : > { %v1124_v25 = vadd.f32 %v979_v21, %v710_v22 }
  0x94   : > { %v779_v5 = vpack.c.bf16 %v1124_v25, %v1124_v25 }
  0x99   : > { %v712_v27 = vpop.f32.mrf.mxu1 }
  0x9a   : > { %v1126_v28 = vadd.f32 %v979_v21, %v712_v27  ;;  %v715_v21 = vld [vmem:[%s1220_s11] sm:$0xff] }
  0x9c   : > { %722 = vrot.lane.b32.xlu2 %v1126_v28, %s994_s30 }
  0xa4   : > { %652 = vrot.lane.b32.xlu2 %v650_v42, %s995_s25 }
  0xac   : > { %737 = vrot.lane.b32.xlu2 %v732_v43, %s995_s25 }
  0xf6   : > { %v723_v48 = vpop.permute.xlu2 %722 }
  0xf7   : > { %v724_v49 = vsel %vm643_vm5, %v723_v48, %v1126_v28 }
  0xfe   : > { %v653_v57 = vpop.permute.xlu2 %652 }
  0xff   : > { %v580_v23 = vpop.xlane.xlu0 %579 }
 0x100   : > { %v581_v24 = vmul.f32 %v580_v23, %v574_v13  ;;  %v780_v13 = vpack.c.bf16 %v1126_v28, %v1126_v28  ;;  %v717_v23 = vmul.f32 %v715_v21, %v1124_v25 }
 0x102   : > { %v582_v26 = vadd.f32 1e-05, %v581_v24 }
 0x104   : > { %983 = vrsqrt.f32 %v582_v26  ;;  %vm589_vm3 = vweird.f32 %v582_v26 }
 0x106   : > { %v738_v60 = vpop.permute.xlu2 %737 }
 0x10a   : > { %v984_v29 = vpop.eup %983 }
 0x10b   : > { %v584_v30 = vmul.f32 %v984_v29, %v582_v26  ;;  %vm590_vm2 = vweird.f32 %v984_v29 }
 0x10c   : > { %vm591_vm4 = vmor %vm589_vm3, %vm590_vm2 }
 0x10d   : > { %v585_v31 = vmul.f32 %v984_v29, %v584_v30 }
 0x10f   : > { %v586_v32 = vmul.f32 0.5, %v585_v31 }
 0x111   : > { %v587_v33 = vsub.f32 1.5, %v586_v32  ;;  %v716_v32 = vld [vmem:[%s1220_s11 + $0x8] sm:$0xff] }
 0x113   : > { %v588_v34 = vmul.f32 %v984_v29, %v587_v33  ;;  %v718_v33 = vmul.f32 %v716_v32, %v1126_v28 }
 0x115   : > { %v592_v36 = vsel %vm591_vm4, %v984_v29, %v588_v34 }
 0x116   : > { %v593_v37 = vmul.f32 %v592_v36, %v576_v16 }
 0x118   : > { %v598_v39 = vmul.f32 %v977_v35, %v593_v37 }
 0x11a   : > { %v603_v40 = vadd.f32 %v978_v38, %v598_v39 }
 0x11c   : > { %v604_v41 = vpack.c.bf16 %v603_v40, %v603_v40 }
 0x11e   : > { %943 = vmatmul.msk.bf16.vlgmr.msra.gmra.mxu0 %vm564_vm0, %v604_v41 }
 0x19b   : > { %v637_v45 = vpop.f32.mrf.mxu0 }
 0x19c   : > { %v638_v46 = vadd.f32 %v980_v44, %v637_v45 }
 0x19e   : > { %644 = vrot.lane.b32.xlu1 %v638_v46, %s994_s30  ;;  %v642_v16 = vmul.f32 %v641_v15, %v638_v46 }
 0x1a3   : > { %v639_v47 = vpop.f32.mrf.mxu0 }
 0x1a6   : > { %719 = vrot.lane.b32.xlu1 %v1124_v25, %s994_s30 }
 0x1ae   : > { %727 = vrot.lane.b32.xlu1 %v724_v49, %s994_s30 }
 0x1b6   : > { %735 = vrot.lane.b32.xlu1 %v731_v50, %s995_s25  ;;  %s551_s25 = scalar_lea.vmem %s1223_s14, %s930_s18 }
 0x1be   : > { %663 = vrot.lane.b32.xlu1 %v661_v51, %s996_s20 }
 0x210   : > { %v645_v52 = vpop.permute.xlu1 %644 }
 0x211   : > { %v646_v53 = vsel %vm643_vm5, %v645_v52, %v638_v46 }
 0x212   : > { %647 = vrot.lane.b32.xlu2 %v646_v53, %s994_s30 }
 0x218   : > { %v720_v55 = vpop.permute.xlu1 %719 }
 0x219   : > { %v721_v56 = vsel %vm643_vm5, %v720_v55, %v1124_v25 }
 0x21a   : > { %725 = vrot.lane.b32.xlu0 %v721_v56, %s994_s30  ;;  %757 = vrot.lane.b32.xlu2 %v753_v54, %s996_s20  ;;  %s998_s30 = smov 97  }
 0x220   : > { %v728_v59 = vpop.permute.xlu1 %727 }
 0x221   : > { %v730_v61 = vsel %vm643_vm5, %v728_v59, %v1126_v28 }
 0x222   : > { %759 = vrot.lane.b32.xlu0 %v754_v58, %s996_s20  ;;  %v742_v62 = vmul.f32 %v738_v60, %v730_v61 }
 0x228   : > { %v736_v63 = vpop.permute.xlu1 %735 }
 0x22a   : > { %747 = vrot.lane.b32.xlu0 %v742_v62, %s997_s28 }
 0x230   : > { %v664_v3 = vpop.permute.xlu1 %663 }
 0x26c   : > { %v648_v0 = vpop.permute.xlu2 %647 }
 0x26d   : > { %v649_v1 = vsel %vm643_vm5, %v648_v0, %v638_v46 }
 0x26e   : > { %v655_v2 = vmul.f32 %v653_v57, %v649_v1  ;;  %v666_v4 = vmul.f32 %v664_v3, %v649_v1 }
 0x270   : > { %657 = vrot.lane.b32.xlu1 %v655_v2, %s997_s28 }
 0x274   : > { %v758_v9 = vpop.permute.xlu2 %757 }
 0x278   : > { %668 = vrot.lane.b32.xlu1 %v666_v4, %s998_s30 }
 0x280   : > { %783 = vrot.lane.b32.xlu1 %v779_v5, %s999_s29 }
 0x28c   : > { %v726_v6 = vpop.permute.xlu0 %725 }
 0x28d   : > { %v729_v7 = vsel %vm643_vm5, %v726_v6, %v1124_v25 }
 0x28e   : > { %v741_v8 = vmul.f32 %v736_v63, %v729_v7  ;;  %v763_v12 = vmul.f32 %v758_v9, %v729_v7 }
 0x290   : > { %745 = vrot.lane.b32.xlu2 %v741_v8, %s997_s28  ;;  %s561_s28 = scalar_lea.vmem %s1225_s16, %s1096_s23 }
 0x294   : > { %v760_v10 = vpop.permute.xlu0 %759 }
 0x295   : > { %v764_v11 = vmul.f32 %v760_v10, %v730_v61 }
 0x297   : > { %769 = vrot.lane.b32.xlu0 %v764_v11, %s998_s30 }
 0x298   : > { %767 = vrot.lane.b32.xlu2 %v763_v12, %s998_s30 }
 0x29c   : > { %v748_v31 = vpop.permute.xlu0 %747 }
 0x29d   : > { %v752_v34 = vadd.f32 %v748_v31, %v718_v33 }
 0x2a0   : > { %785 = vrot.lane.b32.xlu2 %v780_v13, %s999_s29 }
 0x2e2   : > { %v658_v14 = vpop.permute.xlu1 %657 }
 0x2e3   : > { %v660_v17 = vadd.f32 %v658_v14, %v642_v16 }
 0x2ea   : > { %v746_v18 = vpop.permute.xlu2 %745  ;;  %v669_v19 = vpop.permute.xlu1 %668 }
 0x2eb   : > { %v671_v20 = vadd.f32 %v669_v19, %v660_v17  ;;  %v751_v24 = vadd.f32 %v746_v18, %v717_v23 }
 0x2ed   : > { %v672_v22 = vpack.c.bf16 %v671_v20, %v671_v20 }
 0x2ef   : > { %674 = vst.msk [vmem:[%s551_s25] sm:$0xf] %vm673_vm6, %v672_v22 }
 0x2f2   : > { %v768_v26 = vpop.permute.xlu2 %767  ;;  %v784_v27 = vpop.permute.xlu1 %783 }
 0x2f3   : > { %v773_v29 = vadd.f32 %v768_v26, %v751_v24  ;;  %789 = vst.msk [vmem:[%s561_s28] sm:$0xf] %vm673_vm6, %v784_v27 }
 0x2f5   : > { %v775_v30 = vpack.c.bf16 %v773_v29, %v773_v29 }
 0x2f7   : > { %777 = vst.msk [vmem:[%s556_s0] sm:$0xf] %vm673_vm6, %v775_v30 }
 0x2fa   : > { %v786_v25 = vpop.permute.xlu2 %785 }
 0x2fb   : > { %790 = vst.msk [vmem:[%s561_s28 + $0x4] sm:$0xf] %vm673_vm6, %v786_v25 }
 0x309   : > { %v770_v35 = vpop.permute.xlu0 %769 }
 0x30a   : > { %v774_v36 = vadd.f32 %v770_v35, %v752_v34 }
 0x30c   : > { %v776_v37 = vpack.c.bf16 %v774_v36, %v774_v36 }
 0x30e   : > { %778 = vst.msk [vmem:[%s556_s0 + $0x4] sm:$0xf] %vm673_vm6, %v776_v37 }
 0x30f PF: > { %s27_s21 = sadd.s32 1, %s991_s21  }
 0x310   : > { %p24_p4 = scmp.ge.s32.totalorder %s27_s21, 4  }
 0x312   :  { %26 = sbr.rel (!%p24_p4) target bundleno = 2 (0x2), region = 133 }

// kernel: decoder_layer.8
= control target key start
LH: loop header
LB: loop body
LE: loop exit
PB: predicated region body
PF: predicated region fallthrough
CT: control target
= control target key end

     0   :  { %s973_s24 = smov 0   ;;  %s975_s25 = smov 0   ;;  %s1068_s0 = inlined_call_operand.vmem [shape: bf16[2,8,32], index: 0, kind: input, shape index: {}]   ;;  %s1069_s1 = inlined_call_operand.vmem [shape: bf16[2,16,32], index: 1, kind: input, shape index: {}]   ;;  %s1070_s2 = inlined_call_operand.vmem [shape: bf16[2,16,32], index: 2, kind: input, shape index: {}]   ;;  %s1071_s3 = inlined_call_operand.vmem [shape: f32[2,1,16], index: 3, kind: input, shape index: {}]   ;;  %s1072_s4 = inlined_call_operand.vmem [shape: bf16[32,32], index: 4, kind: input, shape index: {}]   ;;  %s1073_s5 = inlined_call_operand.vmem [shape: f32[1,32], index: 5, kind: input, shape index: {}]   ;;  %s1074_s6 = inlined_call_operand.vmem [shape: f32[2,8,32], index: 6, kind: input, shape index: {}]   ;;  %s1075_s7 = inlined_call_operand.vmem [shape: f32[2,8,32], index: 7, kind: output, shape index: {}]  }
   0x1   :  { %s977_s26 = smov 0  }
   0x2 LB: > { %s29_s27 = sadd.s32 1, %s921_s25  ;;  %p814_p0 = scmp.ge.s32.totalorder %s925_s26, 1  ;;  %s925_s26 = sphi %s977_s26, %s17_s26   ;;  %s921_s25 = sphi %s975_s25, %s1077_s25   ;;  %s917_s24 = sphi %s973_s24, %s1076_s24  }
   0x3   : > { %p31_p1 = scmp.ge.s32.totalorder %s29_s27, 2  ;;  %p297_p2 = scmp.lt.s32.totalorder %s925_s26, 3 }
   0x5   : > { %s1079_s27 = smov (%p31_p1, %s29_s27), 0  ;;  %p298_p3 = pnand %p814_p0, %p297_p2 }
   0x6   : > { %p353_p4 = scmp.lt.s32.totalorder (!%p298_p3), %s917_s24, 1  ;;  %s927_s16 = smov (!%p298_p3), 112  }
   0x7   : > { %301 = sbr.rel (%p298_p3) target bundleno = 1218 (0x4c2), region = 48  ;;  %s928_s17 = smov (!%p298_p3), 104  }
   0x8   : > { %s929_s18 = smov (!%p298_p3), 120   ;;  %s930_s22 = smov (!%p298_p3), 8  }
   0x9   : > { %s931_s23 = smov (!%p298_p3), 16  }
   0xc   : > { %s1081_s24 = smov (!%p353_p4, %s917_s24), 1  ;;  %vm402_vm0 = vcmask 64512   ;;  %vm422_vm1 = vcmask 130048   ;;  %vm646_vm2 = vcmask 195584   ;;  %vm669_vm3 = vcmask 261120  }
   0xd   : > { %s991_s28 = sshll.u32 %s1081_s24, 3  ;;  %s372_s11 = scalar_lea.vmem %s1071_s3, %s1081_s24 }
   0xe   : > { %s364_s8 = scalar_lea.vmem %s1069_s1, %s991_s28  ;;  %s815_s12 = sshll.u32 %s1081_s24, 2  ;;  %v885_v5 = vld [vmem:[%s372_s11] ss:$0 sm:$0xff] }
   0xf   : > { %v851_v0 = vld [vmem:[%s364_s8] sm:$0xff]  ;;  %s359_s15 = scalar_lea.vmem %s1068_s0, %s815_s12  ;;  %s369_s21 = scalar_lea.vmem %s1070_s2, %s991_s28 }
  0x10   : > { %v407_v1 = vsel %vm402_vm0, %v851_v0, 0  ;;  %v389_v2 = vld [vmem:[%s359_s15] sm:$0xf]  ;;  %518 = vrot.lane.b32.xlu2 %v851_v0, %s927_s16  ;;  %s932_s24 = smov 24   ;;  %s379_s12 = scalar_lea.vmem %s1074_s6, %s991_s28 }
  0x11   : > { %416 = vmatpush.bf16.xpose.msra.mxu0 %v407_v1  ;;  %v459_v3 = vunpack.c.l.b16 %v389_v2  ;;  %v852_v20 = vld [vmem:[%s369_s21] sm:$0xff] }
  0x12   : > { %451 = vmatpush.bf16.msra.mxu1 %v852_v20 }
  0x13   : > { %v460_v4 = vpack.c.b16 %v459_v3, %v459_v3 }
  0x18   : > { %826 = vmatmul.msk.bf16.vlgmr.msra.gmra.mxu0 %vm402_vm0, %v389_v2  ;;  %573 = vrot.lane.b32.xlu2 %v851_v0, %s928_s17 }
  0x20   : > { %516 = vrot.lane.b32.xlu2 %v460_v4, %s927_s16 }
  0x28   : > { %571 = vrot.lane.b32.xlu2 %v460_v4, %s928_s17 }
  0x6a   : > { %v519_v10 = vpop.permute.xlu2 %518 }
  0x6b   : > { %v524_v21 = vsel %vm402_vm0, %v519_v10, 0 }
  0x6c   : > { %533 = vmatpush.bf16.xpose.msrb.mxu1 %v524_v21 }
  0x72   : > { %v574_v11 = vpop.permute.xlu2 %573 }
  0x73   : > { %v579_v16 = vsel %vm402_vm0, %v574_v11, 0 }
  0x74   : > { %588 = vmatpush.bf16.xpose.msrb.mxu0 %v579_v16 }
  0x7a   : > { %v517_v15 = vpop.permute.xlu2 %516 }
  0x82   : > { %v572_v19 = vpop.permute.xlu2 %571 }
  0x83   : > { %836 = vmatmul.msk.bf16.vlgmr.msrb.gmra.mxu0 %vm402_vm0, %v572_v19 }
  0x95   : > { %v418_v6 = vpop.f32.mrf.mxu0 }
  0x96   : > { %v419_v7 = vadd.f32 %v885_v5, %v418_v6 }
  0x98   : > { %v423_v8 = vsel %vm422_vm1, %v419_v7, -inf }
  0x99   : > { %424 = vmax.xlane.f32.xlu0 %v423_v8 }
  0x9d   : > { %v420_v9 = vpop.f32.mrf.mxu0 }
  0xad   : > { %463 = vrot.lane.b32.xlu0 %v851_v0, %s929_s18 }
 0x100   : > { %v590_v28 = vpop.f32.mrf.mxu0 }
 0x101   : > { %v591_v29 = vadd.f32 %v885_v5, %v590_v28 }
 0x103   : > { %v594_v30 = vsel %vm422_vm1, %v591_v29, -inf }
 0x108   : > { %v592_v31 = vpop.f32.mrf.mxu0 }
 0x10c   : > { %v425_v12 = vpop.xlane.xlu0 %424 }
 0x10d   : > { %v426_v13 = vsub.f32 %v419_v7, %v425_v12 }
 0x10f   : > { %v427_v14 = vmul.f32 1.442695, %v426_v13 }
 0x111   : > { %887 = vpow2.f32 %v427_v14 }
 0x117   : > { %v888_v17 = vpop.eup %887 }
 0x118   : > { %v429_v18 = vsel %vm422_vm1, %v888_v17, 0.0 }
 0x119   : > { %430 = vadd.xlane.f32.xlu1 %v429_v18 }
 0x11f   : > { %v464_v22 = vpop.permute.xlu0 %463 }
 0x120   : > { %v469_v23 = vsel %vm402_vm0, %v464_v22, 0 }
 0x121   : > { %478 = vmatpush.bf16.xpose.msra.mxu2 %v469_v23 }
 0x132   : > { %461 = vrot.lane.b32.xlu1 %v460_v4, %s929_s18 }
 0x15c   : > { %595 = vmax.xlane.f32.xlu1 %v594_v30 }
 0x18c   : > { %v431_v24 = vpop.xlane.xlu1 %430 }
 0x18d   : > { %889 = vrcp.f32 %v431_v24  ;;  %v854_v24 = vld [vmem:[%s1072_s4 + $0x8] sm:$0xff] }
 0x193   : > { %v890_v25 = vpop.eup %889 }
 0x194   : > { %v433_v26 = vmul.f32 %v890_v25, %v888_v17  ;;  %v853_v25 = vld [vmem:[%s1072_s4] sm:$0xff] }
 0x196   : > { %v434_v27 = vpack.c.bf16 %v433_v26, %v433_v26 }
 0x198   : > { %831 = vmatmul.msk.bf16.vlgmr.msra.gmra.mxu1 %vm422_vm1, %v434_v27 }
 0x199   : > { %678 = vmatpush.bf16.msra.mxu1 %v854_v24 }
 0x19d   : > { %679 = vmatpush.bf16.msra.mxu1 %v853_v25 }
 0x1a4   : > { %v462_v32 = vpop.permute.xlu1 %461 }
 0x1a5   : > { %832 = vmatmul.msk.bf16.vlgmr.msra.gmra.mxu2 %vm402_vm0, %v462_v32 }
 0x1a8   : > { %834 = vmatmul.msk.bf16.vlgmr.msrb.gmra.mxu1 %vm402_vm0, %v517_v15 }
 0x1cf   : > { %v596_v45 = vpop.xlane.xlu1 %595 }
 0x1d0   : > { %v597_v49 = vsub.f32 %v591_v29, %v596_v45 }
 0x1d2   : > { %v598_v51 = vmul.f32 1.442695, %v597_v49 }
 0x215   : > { %v1025_v33 = vpop.f32.mrf.mxu1 }
 0x216   : > { %v457_v27 = vpack.c.bf16 %v1025_v33, %v1025_v33  ;;  %v685_v33 = vld [vmem:[%s379_s12] sm:$0xff] }
 0x21d   : > { %v455_v34 = vpop.f32.mrf.mxu1 }
 0x21e   : > { %v886_v34 = vld [vmem:[%s1073_s5] ss:$0 sm:$0xff] }
 0x225   : > { %v535_v35 = vpop.f32.mrf.mxu1 }
 0x226   : > { %v536_v36 = vadd.f32 %v885_v5, %v535_v35 }
 0x228   : > { %v480_v37 = vpop.f32.mrf.mxu2  ;;  %v539_v38 = vsel %vm422_vm1, %v536_v36, -inf }
 0x229   : > { %v481_v39 = vadd.f32 %v885_v5, %v480_v37  ;;  %540 = vmax.xlane.f32.xlu2 %v539_v38 }
 0x22b   : > { %v484_v40 = vsel %vm422_vm1, %v481_v39, -inf }
 0x22c   : > { %485 = vmax.xlane.f32.xlu0 %v484_v40 }
 0x22d   : > { %v537_v41 = vpop.f32.mrf.mxu1 }
 0x230   : > { %v482_v42 = vpop.f32.mrf.mxu2 }
 0x241   : > { %496 = vrot.lane.b32.xlu2 %v852_v20, %s929_s18 }
 0x29c   : > { %v541_v43 = vpop.xlane.xlu2 %540 }
 0x29d   : > { %v542_v44 = vsub.f32 %v536_v36, %v541_v43 }
 0x29f   : > { %v543_v46 = vmul.f32 1.442695, %v542_v44  ;;  %v486_v47 = vpop.xlane.xlu0 %485 }
 0x2a0   : > { %v487_v48 = vsub.f32 %v481_v39, %v486_v47 }
 0x2a1   : > { %891 = vpow2.f32 %v543_v46 }
 0x2a2   : > { %v488_v50 = vmul.f32 1.442695, %v487_v48 }
 0x2a4   : > { %893 = vpow2.f32 %v488_v50  ;;  %v497_v58 = vpop.permute.xlu2 %496 }
 0x2a5   : > { %895 = vpow2.f32 %v598_v51  ;;  %509 = vmatpush.bf16.msra.mxu3 %v497_v58 }
 0x2a7   : > { %v892_v52 = vpop.eup %891 }
 0x2a8   : > { %v545_v53 = vsel %vm422_vm1, %v892_v52, 0.0 }
 0x2a9   : > { %546 = vadd.xlane.f32.xlu1 %v545_v53 }
 0x2aa   : > { %v894_v54 = vpop.eup %893 }
 0x2ab   : > { %v490_v55 = vsel %vm422_vm1, %v894_v54, 0.0  ;;  %v896_v56 = vpop.eup %895 }
 0x2ac   : > { %491 = vadd.xlane.f32.xlu0 %v490_v55  ;;  %v600_v57 = vsel %vm422_vm1, %v896_v56, 0.0 }
 0x2b4   : > { %601 = vadd.xlane.f32.xlu0 %v600_v57 }
 0x2c2   : > { %551 = vrot.lane.b32.xlu1 %v852_v20, %s927_s16 }
 0x2c8   : > { %606 = vrot.lane.b32.xlu0 %v852_v20, %s928_s17  ;;  %s386_s17 = scalar_lea.vmem %s1075_s7, %s991_s28 }
 0x31c   : > { %v547_v62 = vpop.xlane.xlu1 %546 }
 0x31f   : > { %v492_v59 = vpop.xlane.xlu0 %491 }
 0x320   : > { %897 = vrcp.f32 %v492_v59 }
 0x321   : > { %899 = vrcp.f32 %v547_v62 }
 0x326   : > { %v898_v60 = vpop.eup %897 }
 0x327   : > { %v494_v61 = vmul.f32 %v898_v60, %v894_v54  ;;  %v602_v0 = vpop.xlane.xlu0 %601  ;;  %v900_v1 = vpop.eup %899 }
 0x328   : > { %901 = vrcp.f32 %v602_v0  ;;  %v549_v4 = vmul.f32 %v900_v1, %v892_v52 }
 0x329   : > { %v495_v63 = vpack.c.bf16 %v494_v61, %v494_v61 }
 0x32a   : > { %v550_v6 = vpack.c.bf16 %v549_v4, %v549_v4 }
 0x32b   : > { %833 = vmatmul.msk.bf16.vlgmr.msra.gmra.mxu3 %vm422_vm1, %v495_v63 }
 0x32e   : > { %v902_v3 = vpop.eup %901 }
 0x32f   : > { %v604_v5 = vmul.f32 %v902_v3, %v896_v56 }
 0x331   : > { %v605_v8 = vpack.c.bf16 %v604_v5, %v604_v5 }
 0x334   : > { %v552_v2 = vpop.permute.xlu1 %551 }
 0x335   : > { %564 = vmatpush.bf16.msrb.mxu3 %v552_v2 }
 0x33a   : > { %v607_v7 = vpop.permute.xlu0 %606 }
 0x33b   : > { %835 = vmatmul.msk.bf16.vlgmr.msrb.gmra.mxu3 %vm422_vm1, %v550_v6  ;;  %619 = vmatpush.bf16.msrb.mxu2 %v607_v7 }
 0x33e   : > { %837 = vmatmul.msk.bf16.vlgmr.msrb.gmra.mxu2 %vm422_vm1, %v605_v8 }
 0x3ae   : > { %v511_v9 = vpop.f32.mrf.mxu3 }
 0x3af   : > { %v515_v10 = vpack.c.bf16 %v511_v9, %v511_v9 }
 0x3b1   : > { %v627_v11 = vunpack.c.l.b16 %v515_v10 }
 0x3b3   : > { %v628_v12 = vpack.c.b16 %v627_v11, %v627_v11 }
 0x3b5   : > { %629 = vrot.lane.b32.xlu2 %v628_v12, %s930_s22 }
 0x3b6   : > { %v513_v13 = vpop.f32.mrf.mxu3 }
 0x3be   : > { %v566_v14 = vpop.f32.mrf.mxu3 }
 0x3bf   : > { %v570_v15 = vpack.c.bf16 %v566_v14, %v566_v14 }
 0x3c1   : > { %v632_v16 = vunpack.c.l.b16 %v570_v15  ;;  %v621_v17 = vpop.f32.mrf.mxu2 }
 0x3c2   : > { %v625_v18 = vpack.c.bf16 %v621_v17, %v621_v17 }
 0x3c3   : > { %v633_v19 = vpack.c.b16 %v632_v16, %v632_v16 }
 0x3c4   : > { %v637_v20 = vunpack.c.l.b16 %v625_v18 }
 0x3c5   : > { %634 = vrot.lane.b32.xlu2 %v633_v19, %s931_s23 }
 0x3c6   : > { %v638_v21 = vpack.c.b16 %v637_v20, %v637_v20  ;;  %v568_v22 = vpop.f32.mrf.mxu3 }
 0x3c8   : > { %639 = vrot.lane.b32.xlu0 %v638_v21, %s932_s24 }
 0x3c9   : > { %v623_v23 = vpop.f32.mrf.mxu2 }
 0x40f   : > { %v630_v26 = vpop.permute.xlu2 %629 }
 0x410   : > { %v643_v29 = vsel %vm402_vm0, %v457_v27, %v630_v26 }
 0x41f   : > { %v635_v28 = vpop.permute.xlu2 %634 }
 0x420   : > { %v645_v30 = vsel %vm422_vm1, %v643_v29, %v635_v28 }
 0x43a   : > { %v640_v31 = vpop.permute.xlu0 %639 }
 0x43b   : > { %v648_v32 = vsel %vm646_vm2, %v645_v30, %v640_v31 }
 0x43c   : > { %846 = vmatmul.msk.bf16.vlgmr.msra.gmra.mxu1 %vm669_vm3, %v648_v32 }
 0x4b9   : > { %v681_v35 = vpop.f32.mrf.mxu1 }
 0x4ba   : > { %v682_v36 = vadd.f32 %v886_v34, %v681_v35 }
 0x4bc   : > { %v686_v37 = vadd.f32 %v685_v33, %v682_v36 }
 0x4be   : > { %687 = vst.msk [vmem:[%s386_s17] sm:$0xff] %vm669_vm3, %v686_v37 }
 0x4c1   : > { %v683_v38 = vpop.f32.mrf.mxu1 }
 0x4c2 PF: > { %s17_s26 = sadd.s32 1, %s925_s26   ;;  %s1076_s24 = smov %s921_s25 }
 0x4c3   : > { %p14_p5 = scmp.ge.s32.totalorder %s17_s26, 4   ;;  %s1077_s25 = smov %s1079_s27 }
 0x4c5   :  { %16 = sbr.rel (!%p14_p5) target bundleno = 2 (0x2), region = 90 }

// kernel: decoder_layer.9
= control target key start
LH: loop header
LB: loop body
LE: loop exit
PB: predicated region body
PF: predicated region fallthrough
CT: control target
= control target key end

     0   :  { %12 = vsyncpa [#allocation5], 0  ;;  %s1048_s0 = inlined_call_operand.vmem [shape: f32[16,32], index: 0, kind: input, shape index: {}]   ;;  %s1049_s1 = inlined_call_operand.vmem [shape: f32[1,32], index: 1, kind: input, shape index: {}]   ;;  %s1050_s2 = inlined_call_operand.vmem [shape: f32[1,32], index: 2, kind: input, shape index: {}]   ;;  %s1051_s3 = inlined_call_operand.vmem [shape: bf16[32,128], index: 3, kind: input, shape index: {}]   ;;  %s1052_s4 = inlined_call_operand.vmem [shape: f32[1,128], index: 4, kind: input, shape index: {}]   ;;  %s1053_s5 = inlined_call_operand.vmem [shape: bf16[128,32], index: 5, kind: input, shape index: {}]   ;;  %s1054_s6 = inlined_call_operand.vmem [shape: f32[1,32], index: 6, kind: input, shape index: {}]   ;;  %s1055_s7 = inlined_call_operand.hbm [shape: f32[16,32], index: 7, kind: output, shape index: {}]  }
   0x1   :  { %14 = vsyncpa [#allocation5 + $0x1], 0  ;;  %s897_s24 = smov 0   ;;  %s899_s25 = smov 0  }
   0x2   :  { %s901_s26 = smov 0   ;;  %s903_s27 = smov 0  }
   0x3   :  { %s905_s28 = smov 0   ;;  %s907_s29 = smov 0  }
   0x4 LB: > { %s645_s30 = sadd.s32 4294967295, %s853_s29   ;;  %s646_s8 = sadd.s32 4294967294, %s853_s29   ;;  %s853_s29 = sphi %s907_s29, %s20_s29   ;;  %s849_s28 = sphi %s905_s28, %s1062_s28   ;;  %s845_s27 = sphi %s903_s27, %s1061_s27   ;;  %s841_s26 = sphi %s901_s26, %s1060_s26   ;;  %s837_s25 = sphi %s899_s25, %s1059_s25   ;;  %s833_s24 = sphi %s897_s24, %s1058_s24  }
   0x5   : > { %s32_s9 = sadd.s32 1, %s849_s28  ;;  %s206_s10 = sadd.s32 1, %s841_s26 }
   0x6   : > { %p34_p0 = scmp.ge.s32.totalorder %s32_s9, 2  ;;  %p216_p1 = scmp.ne.s32.totalorder %s841_s26, %s837_s25 }
   0x7   : > { %p217_p2 = scmp.eq.s32.totalorder %s645_s30, 1  ;;  %p222_p3 = scmp.ne.s32.totalorder %s837_s25, %s833_s24 }
   0x8   : > { %s1064_s9 = smov (%p34_p0, %s32_s9), 0  ;;  %p223_p5 = scmp.eq.s32.totalorder %s646_s8, 1 }
   0x9   : > { %p937_p4 = por %p217_p2, %p216_p1  ;;  %s203_s12 = ssub.s32 %s849_s28, %s1064_s9 }
   0xa   : > { %p652_p6 = scmp.ge.s32.totalorder %s853_s29, 1  ;;  %p204_p7 = scmp.eq.s32.totalorder %s203_s12, 0 }
   0xb   : > { %p944_p8 = por %p223_p5, %p222_p3  ;;  %p279_p9 = scmp.lt.s32.totalorder %s853_s29, 3 }
   0xc   : > { %s950_s14 = scalar_select %p204_p7, %s841_s26, %s206_s10  }
   0xd   : > { %p280_p10 = pnand %p652_p6, %p279_p9 }
   0xe   : > { %p322_p11 = scmp.lt.s32.totalorder (!%p280_p10), %s845_s27, 1  ;;  %s319_s20 = sand.u32 (!%p280_p10), 1, %s837_s25  }
   0xf   : > { %283 = sbr.rel (%p280_p10) target bundleno = 578 (0x242), region = 48  ;;  %s653_s21 = sshll.u32 (!%p280_p10), %s319_s20, 3 }
  0x10   : > { %s697_s22 = sshll.u32 (!%p280_p10), %s845_s27, 3 }
  0x11   : > { %s531_s12 = scalar_lea.hbm (!%p280_p10), %s1055_s7, %s697_s22 }
  0x12   : > { %s535_s17 = sshll.u32 (!%p280_p10), %s531_s12, 4  ;;  %s536_s17 = int_to_ptr.hbm [resolvable:$true] %s535_s17 }
  0x13   : > { %s789_s18 = sshra.s32 (!%p280_p10), %s536_s17, 4  ;;  %s790_s18 = int_to_ptr.hbm [resolvable:$true] %s789_s18 }
  0x14   : > { %s323_s15 = scalar_select %p322_p11, %s845_s27, 1  ;;  %vm345_vm0 = vcmask 261120   ;;  %v855_v2 = vmov 32.0   ;;  %v701_v14 = vld [vmem:[%s1051_s3 + $0x8] sm:$0xff]  ;;  %v700_v15 = vld [vmem:[%s1051_s3] sm:$0xff]  ;;  %v709_v19 = vld [vmem:[%s1053_s5 + $0x38] sm:$0xff] }
  0x15   : > { %771 = vrcp.f32 %v855_v2  ;;  %419 = vmatpush.bf16.msra.mxu0 %v701_v14  ;;  %493 = vmatpush.bf16.msra.mxu1 %v709_v19  ;;  %v708_v20 = vld [vmem:[%s1053_s5 + $0x30] sm:$0xff]  ;;  %v707_v23 = vld [vmem:[%s1053_s5 + $0x28] sm:$0xff]  ;;  %v706_v26 = vld [vmem:[%s1053_s5 + $0x20] sm:$0xff]  ;;  %v856_v41 = vmov 0.0   ;;  %s521_s27 = scalar_lea.sflag [#allocation5], %s319_s20  ;;  %p796_p1 = scmp.lt.s32.totalorder %s790_s18, %s1055_s7 }
  0x16   : > { %s654_s16 = sshll.u32 %s323_s15, 3  ;;  %v767_v29 = vld [vmem:[%s1049_s1] ss:$0 sm:$0xff]  ;;  %v705_v30 = vld [vmem:[%s1053_s5 + $0x18] sm:$0xff]  ;;  %v704_v35 = vld [vmem:[%s1053_s5 + $0x10] sm:$0xff]  ;;  %386 = vst.msk [vmem:[#allocation3] sm:$0xff] %vm345_vm0, %v856_v41 }
  0x17   : > { %s325_s19 = scalar_lea.vmem %s1048_s0, %s654_s16  ;;  %v768_v32 = vld [vmem:[%s1050_s2] ss:$0 sm:$0xff]  ;;  %v703_v39 = vld [vmem:[%s1053_s5 + $0x8] sm:$0xff]  ;;  %s321_s15 = scalar_lea.vmem [#allocation4], %s653_s21 }
  0x18   : > { %v957_v0 = vld [vmem:[%s325_s19] sm:$0xff]  ;;  %s533_s16 = sshll.u32 %s321_s15, 4  ;;  %s791_s19 = scalar_lea.hbm %s790_s18, 8  ;;  %s534_s16 = int_to_ptr.vmem [resolvable:$true] %s533_s16 }
  0x19   : > { %v346_v1 = vsel %vm345_vm0, %v957_v0, 0.0  ;;  %420 = vmatpush.bf16.msra.mxu0 %v700_v15  ;;  %494 = vmatpush.bf16.msra.mxu1 %v708_v20  ;;  %v702_v40 = vld [vmem:[%s1053_s5] sm:$0xff]  ;;  %p792_p12 = scmp.ne.s32.totalorder %s790_s18, %s791_s19  ;;  %s795_s21 = scalar_lea.hbm %s1055_s7, 16 }
  0x1a   : > { %347 = vadd.xlane.f32.xlu0 %v346_v1  ;;  %v769_v42 = vld [vmem:[%s1052_s4] ss:$0 sm:$0xff]  ;;  %p797_p2 = scmp.lt.s32.totalorder %s795_s21, %s791_s19 }
  0x1b   : > { %v772_v3 = vpop.eup %771  ;;  %v770_v51 = vld [vmem:[%s1054_s6] ss:$0 sm:$0xff]  ;;  %p793_p13 = pnand %p792_p12, %p937_p4 }
  0x1c   : > { %v350_v4 = vmul.f32 32.0, %v772_v3  ;;  %vm354_vm1 = vweird.f32 %v772_v3  ;;  %p798_p3 = por %p797_p2, %p796_p1 }
  0x1d   : > { %495 = vmatpush.bf16.msra.mxu1 %v707_v23  ;;  %v427_v48 = vld [vmem:[#allocation3] sm:$0xff]  ;;  %p794_p0 = pneg %p793_p13 }
  0x1e   : > { %v351_v5 = vsub.f32 1.0, %v350_v4 }
  0x1f   : > { %p799_p5 = pnand %p798_p3, %p794_p0 }
  0x20   : > { %v352_v6 = vmul.f32 %v772_v3, %v351_v5 }
  0x21   : > { %496 = vmatpush.bf16.msra.mxu1 %v706_v26 }
  0x22   : > { %v353_v7 = vadd.f32 %v772_v3, %v352_v6 }
  0x24   : > { %v355_v8 = vsel %vm354_vm1, %v772_v3, %v353_v7 }
  0x25   : > { %497 = vmatpush.bf16.msra.mxu1 %v705_v30 }
  0x29   : > { %498 = vmatpush.bf16.msra.mxu1 %v704_v35 }
  0x2d   : > { %499 = vmatpush.bf16.msra.mxu1 %v703_v39 }
  0x31   : > { %500 = vmatpush.bf16.msra.mxu1 %v702_v40 }
  0x8d   : > { %v348_v9 = vpop.xlane.xlu0 %347 }
  0x8e   : > { %v356_v10 = vmul.f32 %v355_v8, %v348_v9 }
  0x90   : > { %v357_v11 = vsub.f32 %v957_v0, %v356_v10 }
  0x92   : > { %v358_v12 = vmul.f32 %v357_v11, %v357_v11 }
  0x94   : > { %v359_v13 = vsel %vm345_vm0, %v358_v12, 0.0 }
  0x95   : > { %360 = vadd.xlane.f32.xlu0 %v359_v13 }
 0x108   : > { %v361_v16 = vpop.xlane.xlu0 %360 }
 0x109   : > { %v362_v17 = vmul.f32 %v361_v16, %v355_v8 }
 0x10b   : > { %v363_v18 = vadd.f32 1e-05, %v362_v17 }
 0x10d   : > { %773 = vrsqrt.f32 %v363_v18  ;;  %vm370_vm3 = vweird.f32 %v363_v18 }
 0x113   : > { %v774_v21 = vpop.eup %773 }
 0x114   : > { %v365_v22 = vmul.f32 %v774_v21, %v363_v18  ;;  %vm371_vm2 = vweird.f32 %v774_v21 }
 0x115   : > { %vm372_vm4 = vmor %vm370_vm3, %vm371_vm2 }
 0x116   : > { %v366_v24 = vmul.f32 %v774_v21, %v365_v22 }
 0x118   : > { %v367_v25 = vmul.f32 0.5, %v366_v24 }
 0x11a   : > { %v368_v27 = vsub.f32 1.5, %v367_v25 }
 0x11c   : > { %v369_v28 = vmul.f32 %v774_v21, %v368_v27 }
 0x11e   : > { %v373_v31 = vsel %vm372_vm4, %v774_v21, %v369_v28 }
 0x11f   : > { %v374_v33 = vmul.f32 %v373_v31, %v357_v11 }
 0x121   : > { %v379_v34 = vmul.f32 %v767_v29, %v374_v33 }
 0x123   : > { %v384_v36 = vadd.f32 %v768_v32, %v379_v34 }
 0x125   : > { %385 = vst.msk [vmem:[#allocation2] sm:$0xff] %vm345_vm0, %v384_v36 }
 0x12c   : > { %v387_v37 = vld [vmem:[#allocation2] sm:$0xff] }
 0x12d   : > { %v388_v38 = vpack.c.bf16 %v387_v37, %v387_v37 }
 0x12f   : > { %663 = vmatmul.msk.bf16.vlgmr.msra.gmra.mxu0 %vm345_vm0, %v388_v38 }
 0x1ac   : > { %v422_v43 = vpop.f32.mrf.mxu0 }
 0x1ad   : > { %v423_v44 = vadd.f32 %v769_v42, %v422_v43 }
 0x1af   : > { %v426_v45 = vmax.f32 %v423_v44, 0.0 }
 0x1b1   : > { %v428_v46 = vpack.c.bf16 %v426_v45, %v426_v45 }
 0x1b3   : > { %501 = vmatmul.bf16.vlgmr.msra.gmra.mxu1 %v428_v46 }
 0x1b4   : > { %v424_v47 = vpop.f32.mrf.mxu0 }
 0x230   : > { %v502_v49 = vpop.f32.mrf.mxu1 }
 0x231   : > { %v506_v50 = vadd.f32 %v502_v49, %v427_v48 }
 0x233   : > { %507 = vst.msk [vmem:[#allocation3] sm:$0xff] %vm345_vm0, %v506_v50 }
 0x238   : > { %v504_v52 = vpop.f32.mrf.mxu1 }
 0x23a   : > { %v511_v53 = vld [vmem:[#allocation3] sm:$0xff] }
 0x23b   : > { %v516_v54 = vadd.f32 %v770_v51, %v511_v53 }
 0x23d   : > { %v518_v55 = vadd.f32 %v516_v54, %v957_v0 }
 0x23f   : > { %519 = vst.msk [vmem:[%s321_s15] sm:$0xff] %vm345_vm0, %v518_v55 }
 0x240   : > { %802 = shalt.err (!%p799_p5)
}
 0x241   : > { %710 = dma.vmem_to_hbm [thread:$0]  (%p937_p4), %s534_s16, 128, %s536_s17, %s521_s27  }
 0x242 PF: > { %p716_p6 = scmp.ge.s32.totalorder %s853_s29, 2  ;;  %s547_s20 = sand.u32 1, %s833_s24  }
 0x243   : > { %s548_s10 = scalar_lea.sflag [#allocation5], %s547_s20 }
 0x244   : > { %p713_p7 = pnand %p716_p6, %p944_p8 }
 0x246   : > { %p714_p9 = pneg %p713_p7 }
 0x248   : > { %828 = dma.done.wait (%p714_p9), %s548_s10, 128  }
 0x249   : > { %830 = vsyncadd (%p714_p9), %s548_s10, 4294967168  ;;  %s20_s29 = sadd.s32 1, %s853_s29   ;;  %s1058_s24 = smov %s837_s25 }
 0x24a   : > { %p17_p10 = scmp.ge.s32.totalorder %s20_s29, 4   ;;  %s1059_s25 = smov %s841_s26 }
 0x24b   : > { %s1060_s26 = smov %s950_s14  ;;  %s1061_s27 = smov %s849_s28 }
 0x24c   : > { %s1062_s28 = smov %s1064_s9  ;;  %19 = sbr.rel (!%p17_p10) target bundleno = 4 (0x4), region = 100 }
 0x251   :  { %554 = vsyncpa [#allocation5], 1 }
 0x252   :  { %556 = vsyncpa [#allocation5 + $0x1], 1 }

</bundles_post_ra>
